<compile_context>
chip_gen: v7x
topology: tpu7x:2x2x1
jax: 0.10.0
libtpu: 0.0.40
codegen_flags: <defaults>
</compile_context>

<pallas_src>
import functools

import jax
import jax.numpy as jnp
from jax import lax
from jax.experimental import pallas as pl
from jax.experimental.pallas import tpu as pltpu

EPS = 1e-5
PHASES = ((0, 0), (0, 1), (1, 0), (1, 1))
NUM_PRM = 9  # packed per-channel columns: b1 g1 be1 b2 g2 be2 bu gu beu


def _full_spec(shape):
    n = len(shape)
    return pl.BlockSpec(tuple(shape), lambda *_, n=n: (0,) * n)


def _phase_taps(k):
    """Polyphase tap tables for ConvTranspose2d with padding = k//2.

    taps1[phase] (stride-2 conv): tuples (kh, dh)          -> read x[a + dh], weight tap kh
    taps2[phase] (stride-1 conv): tuples (kh, src_ph, sh)  -> read phase src_ph at a + sh
    """
    p = k // 2
    taps1, taps2 = [], []
    for ph in (0, 1):
        taps1.append(tuple((kh, (ph + p - kh) // 2)
                           for kh in range(k) if (ph + p - kh) % 2 == 0))
        taps2.append(tuple((kh, (ph - kh + p) % 2, (ph - kh + p) // 2)
                           for kh in range(k)))
    return tuple(taps1), tuple(taps2)


# ----------------------------- fused Pallas kernel ---------------------------

def _fused_block_kernel(x_ref, p_ref, out_ref, *, N, H, W, k,
                        taps1, taps2, alpha1, alpha_out):
    f32 = jnp.float32
    Cin = x_ref.shape[0]
    Cout = out_ref.shape[0]
    NS = N * H * W                 # flattened per-phase spatial extent (lane dim)
    cnt = 4.0 * NS                 # elements per channel at full output resolution

    x = x_ref[...]                 # (Cin, NS), already f32 and lane-dense
    p = p_ref[...]                 # (Cout, P) packed params + weights (single vreg-ish)
    b1, g1, be1, b2, g2, be2, bu, gu, beu = (p[:, i:i + 1] for i in range(NUM_PRM))

    # ---- boundary masks for flat-lane spatial shifts (built once) -----------
    def _mod(v, d):
        return jnp.bitwise_and(v, d - 1) if (d & (d - 1)) == 0 else v % d

    fidx = lax.broadcasted_iota(jnp.int32, (1, NS), 1)
    m_hw = _mod(fidx, H * W)       # position within one image
    m_w = _mod(fidx, W)            # column index
    mask_h = {0: None,
              1: (m_hw < (H - 1) * W).astype(f32),
              -1: (m_hw >= W).astype(f32)}
    mask_w = {0: None,
              1: (m_w < (W - 1)).astype(f32),
              -1: (m_w >= 1).astype(f32)}

    def shifted(arr, dh, dw):
        """arr viewed as (C, N, H, W) flat; return arr[..., a+dh, b+dw], zero outside bounds."""
        s = dh * W + dw
        y = arr if s == 0 else pltpu.roll(arr, shift=(-s) % NS, axis=1)  # y[f] = arr[f + s]
        m = mask_h[dh]
        if mask_w[dw] is not None:
            m = mask_w[dw] if m is None else m * mask_w[dw]
        return y if m is None else y * m

    def stack_rows(pieces):
        return pieces[0] if len(pieces) == 1 else jnp.concatenate(pieces, axis=0)

    # ---- block1: ConvTranspose2d(k, stride=2, pad=k//2): one dot per phase ---
    off = NUM_PRM
    x_sh = {}
    y1 = []
    for (ph, pw) in PHASES:
        pieces = []
        for (kh, dh) in taps1[ph]:
            for (kw, dw) in taps1[pw]:
                if (dh, dw) not in x_sh:
                    x_sh[(dh, dw)] = shifted(x, dh, dw)
                pieces.append(x_sh[(dh, dw)])
        ncol = len(pieces) * Cin
        w_ph = p[:, off:off + ncol]                       # (Cout, taps*Cin)
        off += ncol
        y1.append(jnp.dot(w_ph, stack_rows(pieces), preferred_element_type=f32) + b1)

    # ---- BN1 (single-pass stats over the four phases) -> PReLU ---------------
    s1 = sum(jnp.sum(y, axis=1, keepdims=True) for y in y1)
    q1 = sum(jnp.sum(y * y, axis=1, keepdims=True) for y in y1)
    mean1 = s1 / cnt
    var1 = q1 / cnt - mean1 * mean1
    sc1 = g1 * lax.rsqrt(var1 + EPS)
    sh1 = be1 - mean1 * sc1
    r = []
    for y in y1:
        v = sc1 * y + sh1
        r.append(jnp.where(v >= 0.0, v, alpha1 * v))      # (Cout, NS) per phase

    # ---- block2: ConvTranspose2d(k, stride=1, pad=k//2) in phase space -------
    w2f = p[:, off:off + k * k * Cout]                    # (Cout, k*k*Cout), same for all phases
    off += k * k * Cout
    pidx = {q: i for i, q in enumerate(PHASES)}
    r_sh = {}
    y2_parts = []
    for (qh, qw) in PHASES:
        pieces = []
        for (kh, sph, sh) in taps2[qh]:
            for (kw, spw, sw) in taps2[qw]:
                key = (pidx[(sph, spw)], sh, sw)
                if key not in r_sh:
                    r_sh[key] = shifted(r[key[0]], sh, sw)
                pieces.append(r_sh[key])
        y2_parts.append(jnp.dot(w2f, stack_rows(pieces), preferred_element_type=f32))
    y2 = jnp.concatenate(y2_parts, axis=1) + b2           # (Cout, 4*NS), lane-dense

    # ---- BN2 (single pass) -> residual ----------------------------------------
    mean2 = jnp.sum(y2, axis=1, keepdims=True) / cnt
    var2 = jnp.sum(y2 * y2, axis=1, keepdims=True) / cnt - mean2 * mean2
    sc2 = g2 * lax.rsqrt(var2 + EPS)
    sh2 = be2 - mean2 * sc2
    res = sc2 * y2 + sh2

    # ---- upsample: 1x1 stride-2 ConvTranspose2d (only even/even phase has data) + BN
    wuf = p[:, off:off + Cin]                             # (Cout, Cin)
    u00 = jnp.dot(wuf, x, preferred_element_type=f32) + bu
    su = jnp.sum(u00, axis=1, keepdims=True) + (3.0 * NS) * bu
    qu = jnp.sum(u00 * u00, axis=1, keepdims=True) + (3.0 * NS) * bu * bu
    mean_u = su / cnt
    var_u = qu / cnt - mean_u * mean_u
    sc_u = gu * lax.rsqrt(var_u + EPS)
    sh_u = beu - mean_u * sc_u
    ubn00 = sc_u * u00 + sh_u                             # phase (0,0): (Cout, NS)
    ubn_c = sc_u * bu + sh_u                              # three bias-only phases: (Cout, 1)

    # ---- act(upsample_bn + residual): aligned, lane-dense stores --------------
    o0 = res[:, :NS] + ubn00
    o1 = res[:, NS:] + ubn_c
    out_ref[:, :NS] = jnp.where(o0 >= 0.0, o0, alpha_out * o0)
    out_ref[:, NS:] = jnp.where(o1 >= 0.0, o1, alpha_out * o1)


# ----------------------------- module ---------------------------------------

class TransposeResidualBlockPallas:
    def __init__(self, in_channels=4, out_channels=4, kernel_size=3, key=None):
        if key is None:
            key = jax.random.PRNGKey(0)
        ks = jax.random.split(key, 12)
        k = kernel_size
        self.kernel_size = k

        def u(kk, shape, scale):
            return jax.random.uniform(kk, shape, jnp.float32, -scale, scale)

        s1 = 1.0 / (in_channels * k * k) ** 0.5
        s2 = 1.0 / (out_channels * k * k) ** 0.5
        su = 1.0 / in_channels ** 0.5

        # block1: ConvTranspose2d(in, out, k, stride=2, padding=k//2, output_padding=1)
        self.w1 = u(ks[0], (in_channels, out_channels, k, k), s1)
        self.b1 = u(ks[1], (out_channels,), s1)
        # block2: BN -> PReLU -> ConvTranspose2d(out, out, k, padding=k//2) -> BN
        self.g1 = 1.0 + 0.1 * u(ks[2], (out_channels,), 1.0)
        self.be1 = 0.1 * u(ks[3], (out_channels,), 1.0)
        self.a1 = 0.25                        # PReLU default init (num_parameters=1)
        self.w2 = u(ks[4], (out_channels, out_channels, k, k), s2)
        self.b2 = u(ks[5], (out_channels,), s2)
        self.g2 = 1.0 + 0.1 * u(ks[6], (out_channels,), 1.0)
        self.be2 = 0.1 * u(ks[7], (out_channels,), 1.0)
        # upsample: ConvTranspose2d(in, out, 1, stride=2, output_padding=1) + BN
        self.wu = u(ks[8], (in_channels, out_channels, 1, 1), su)
        self.bu = u(ks[9], (out_channels,), su)
        self.gu = 1.0 + 0.1 * u(ks[10], (out_channels,), 1.0)
        self.beu = 0.1 * u(ks[11], (out_channels,), 1.0)
        self.a_out = 0.25                     # final PReLU default init

        # ---- hoisted preprocessing: pack every constant into ONE (Cout, P) array ----
        taps1, taps2 = _phase_taps(k)
        self.taps1, self.taps2 = taps1, taps2
        w1_kk = jnp.transpose(self.w1, (2, 3, 1, 0)).astype(jnp.float32)   # (k,k,Cout,Cin)
        w2_kk = jnp.transpose(self.w2, (2, 3, 1, 0)).astype(jnp.float32)   # (k,k,Cout,Cout)
        cols = [jnp.stack([self.b1, self.g1, self.be1, self.b2, self.g2, self.be2,
                           self.bu, self.gu, self.beu], axis=1).astype(jnp.float32)]
        for (ph, pw) in PHASES:               # block1 per-phase weights, tap order == kernel
            for (kh, _) in taps1[ph]:
                for (kw, _) in taps1[pw]:
                    cols.append(w1_kk[kh, kw])
        for kh in range(k):                   # block2 flattened weight (kh-major, kw-minor)
            for kw in range(k):
                cols.append(w2_kk[kh, kw])
        cols.append(jnp.transpose(self.wu[:, :, 0, 0]).astype(jnp.float32))  # (Cout, Cin)
        self.packed = jnp.concatenate(cols, axis=1)       # (Cout, 9 + 36 + 36 + Cin)

    def __call__(self, x_nchw, output_size):
        N, Cin, H, W = x_nchw.shape
        Hout, Wout = output_size
        if (Hout, Wout) != (2 * H, 2 * W):
            # TODO(synk): the fused polyphase path assumes output_padding=1 (exact 2x
            # upsampling, as in the module constructor); output_size == 2H-1 unsupported.
            raise ValueError("TransposeResidualBlockPallas requires output_size == (2H, 2W)")
        Cout = self.w1.shape[1]
        NS = N * H * W

        # lane-dense channel-major input: (Cin, N*H*W)
        x_flat = jnp.transpose(x_nchw.astype(jnp.float32), (1, 0, 2, 3)).reshape(Cin, NS)

        kernel = functools.partial(
            _fused_block_kernel, N=N, H=H, W=W, k=self.kernel_size,
            taps1=self.taps1, taps2=self.taps2,
            alpha1=float(self.a1), alpha_out=float(self.a_out))

        out_sds = jax.ShapeDtypeStruct((Cout, 4 * NS), jnp.float32)
        out_flat = pl.pallas_call(
            kernel,
            out_shape=out_sds,
            grid=(1,),
            in_specs=[_full_spec(x_flat.shape), _full_spec(self.packed.shape)],
            out_specs=_full_spec(out_sds.shape),
            compiler_params=pltpu.CompilerParams(dimension_semantics=("arbitrary",)),
        )(x_flat, self.packed)

        # de-interleave phases: (c, ph, pw, n, a, b) -> (n, c, 2a+ph, 2b+pw)
        out = out_flat.reshape(Cout, 2, 2, N, H, W)
        out = jnp.transpose(out, (3, 0, 4, 1, 5, 2)).reshape(N, Cout, Hout, Wout)
        return out


# ----------------------------- pure-JAX reference (for self-check) ----------

def _ct_weight_to_conv(w_pt):
    """PyTorch ConvTranspose2d weight (Cin,Cout,KH,KW) -> conv weight (KH,KW,Cin,Cout)."""
    return jnp.flip(w_pt, axis=(2, 3)).transpose(2, 3, 0, 1)


def _ref_forward(m, x_nchw, output_size):
    x = jnp.transpose(x_nchw, (0, 2, 3, 1)).astype(jnp.float32)
    Hout, Wout = output_size

    def conv_t(xx, w_pt, b, stride, padding):
        k = w_pt.shape[2]
        H, W = xx.shape[1], xx.shape[2]
        op_h = Hout - ((H - 1) * stride - 2 * padding + k)
        op_w = Wout - ((W - 1) * stride - 2 * padding + k)
        w = _ct_weight_to_conv(w_pt)
        y = jax.lax.conv_general_dilated(
            xx, w, window_strides=(1, 1),
            padding=((k - 1 - padding, k - 1 - padding + op_h),
                     (k - 1 - padding, k - 1 - padding + op_w)),
            lhs_dilation=(stride, stride),
            dimension_numbers=("NHWC", "HWIO", "NHWC"))
        return y + b.reshape(1, 1, 1, -1)

    def bn(xx, g, b):
        mu = xx.mean((0, 1, 2), keepdims=True)
        var = ((xx - mu) ** 2).mean((0, 1, 2), keepdims=True)
        return (xx - mu) / jnp.sqrt(var + EPS) * g.reshape(1, 1, 1, -1) + b.reshape(1, 1, 1, -1)

    def prelu(xx, a):
        return jnp.where(xx >= 0, xx, a * xx)

    y1 = conv_t(x, m.w1, m.b1, 2, m.kernel_size // 2)
    r = prelu(bn(y1, m.g1, m.be1), m.a1)
    y2 = conv_t(r, m.w2, m.b2, 1, m.kernel_size // 2)
    residual = bn(y2, m.g2, m.be2)
    u = bn(conv_t(x, m.wu, m.bu, 2, 0), m.gu, m.beu)
    out = prelu(u + residual, m.a_out)
    return jnp.transpose(out, (0, 3, 1, 2))


# ----------------------------- main ------------------------------------------

if __name__ == "__main__":
    key = jax.random.PRNGKey(0)
    kx, kp = jax.random.split(key)
    N, C, Hs, Ws = 2, 4, 16, 16
    x = jax.random.normal(kx, (N, C, Hs, Ws), jnp.float32)
    output_size = (2 * Hs, 2 * Ws)

    block = TransposeResidualBlockPallas(in_channels=C, out_channels=C, kernel_size=3, key=kp)
    out = jax.block_until_ready(block(x, output_size))
    assert out.shape == (N, C, output_size[0], output_size[1]), out.shape

    ref = jax.block_until_ready(_ref_forward(block, x, output_size))
    max_err = float(jnp.max(jnp.abs(out - ref)))
    if not bool(jnp.allclose(out, ref, atol=2e-3, rtol=2e-3)):
        raise AssertionError(f"Pallas output mismatch vs JAX reference (max abs err {max_err:.3e})")
    print("KERNEL_OK")
</pallas_src>

<mosaic_0001>
module attributes {stable_mosaic.version = 11 : i64} {
  func.func @_fused_block_kernel(%arg0: i32, %arg1: memref<4x512xf32, #tpu.memory_space<vmem>>, %arg2: memref<4x85xf32, #tpu.memory_space<vmem>>, %arg3: memref<4x2048xf32, #tpu.memory_space<vmem>>) attributes {dimension_semantics = [#tpu.dimension_semantics<arbitrary>], iteration_bounds = array<i64: 1>, scalar_prefetch = 0 : i64, scratch_operands = 0 : i64, tpu.core_type = #tpu.core_type<tc>, window_params = [{pipeline_mode = #tpu.pipeline_mode<synchronous>, transform_indices = @transform_0, window_bounds = array<i64: 4, 512>}, {pipeline_mode = #tpu.pipeline_mode<synchronous>, transform_indices = @transform_1, window_bounds = array<i64: 4, 85>}, {pipeline_mode = #tpu.pipeline_mode<synchronous>, transform_indices = @transform_2, window_bounds = array<i64: 4, 2048>}]} {
    %c0 = arith.constant 0 : index
    %c0_0 = arith.constant 0 : index
    %0 = vector.load %arg1[%c0, %c0_0] : memref<4x512xf32, #tpu.memory_space<vmem>>, vector<4x512xf32>
    %c0_1 = arith.constant 0 : index
    %c0_2 = arith.constant 0 : index
    %1 = vector.load %arg2[%c0_1, %c0_2] : memref<4x85xf32, #tpu.memory_space<vmem>>, vector<4x85xf32>
    %2 = vector.extract_strided_slice %1 {offsets = [0, 0], sizes = [4, 1], strides = [1, 1]} : vector<4x85xf32> to vector<4x1xf32>
    %3 = vector.extract_strided_slice %1 {offsets = [0, 1], sizes = [4, 1], strides = [1, 1]} : vector<4x85xf32> to vector<4x1xf32>
    %4 = vector.extract_strided_slice %1 {offsets = [0, 2], sizes = [4, 1], strides = [1, 1]} : vector<4x85xf32> to vector<4x1xf32>
    %5 = vector.extract_strided_slice %1 {offsets = [0, 3], sizes = [4, 1], strides = [1, 1]} : vector<4x85xf32> to vector<4x1xf32>
    %6 = vector.extract_strided_slice %1 {offsets = [0, 4], sizes = [4, 1], strides = [1, 1]} : vector<4x85xf32> to vector<4x1xf32>
    %7 = vector.extract_strided_slice %1 {offsets = [0, 5], sizes = [4, 1], strides = [1, 1]} : vector<4x85xf32> to vector<4x1xf32>
    %8 = vector.extract_strided_slice %1 {offsets = [0, 6], sizes = [4, 1], strides = [1, 1]} : vector<4x85xf32> to vector<4x1xf32>
    %9 = vector.extract_strided_slice %1 {offsets = [0, 7], sizes = [4, 1], strides = [1, 1]} : vector<4x85xf32> to vector<4x1xf32>
    %10 = vector.extract_strided_slice %1 {offsets = [0, 8], sizes = [4, 1], strides = [1, 1]} : vector<4x85xf32> to vector<4x1xf32>
    %11 = tpu.iota {dimensions = array<i32: 1>} : vector<1x512xi32>
    %c255_i32 = arith.constant 255 : i32
    %12 = vector.broadcast %c255_i32 : i32 to vector<1x512xi32>
    %13 = arith.andi %11, %12 : vector<1x512xi32>
    %c15_i32 = arith.constant 15 : i32
    %14 = vector.broadcast %c15_i32 : i32 to vector<1x512xi32>
    %15 = arith.andi %11, %14 : vector<1x512xi32>
    %c240_i32 = arith.constant 240 : i32
    %16 = vector.broadcast %c240_i32 : i32 to vector<1x512xi32>
    %17 = arith.cmpi slt, %13, %16 : vector<1x512xi32>
    %18 = arith.extui %17 : vector<1x512xi1> to vector<1x512xi32>
    %19 = arith.sitofp %18 : vector<1x512xi32> to vector<1x512xf32>
    %c16_i32 = arith.constant 16 : i32
    %20 = vector.broadcast %c16_i32 : i32 to vector<1x512xi32>
    %21 = arith.cmpi sge, %13, %20 : vector<1x512xi32>
    %22 = arith.extui %21 : vector<1x512xi1> to vector<1x512xi32>
    %23 = arith.sitofp %22 : vector<1x512xi32> to vector<1x512xf32>
    %c15_i32_3 = arith.constant 15 : i32
    %24 = vector.broadcast %c15_i32_3 : i32 to vector<1x512xi32>
    %25 = arith.cmpi slt, %15, %24 : vector<1x512xi32>
    %26 = arith.extui %25 : vector<1x512xi1> to vector<1x512xi32>
    %27 = arith.sitofp %26 : vector<1x512xi32> to vector<1x512xf32>
    %c1_i32 = arith.constant 1 : i32
    %28 = vector.broadcast %c1_i32 : i32 to vector<1x512xi32>
    %29 = arith.cmpi sge, %15, %28 : vector<1x512xi32>
    %30 = arith.extui %29 : vector<1x512xi1> to vector<1x512xi32>
    %31 = arith.sitofp %30 : vector<1x512xi32> to vector<1x512xf32>
    %32 = vector.extract_strided_slice %1 {offsets = [0, 9], sizes = [4, 4], strides = [1, 1]} : vector<4x85xf32> to vector<4x4xf32>
    %cst = arith.constant dense<0.000000e+00> : vector<4x512xf32>
    %33 = tpu.matmul %32, %0, %cst {dimension_numbers = #tpu.dot_dimension_numbers<[1], [0], [0], [1], [0, 0, 1, 1], [], []>} : vector<4x4xf32>, vector<4x512xf32>, vector<4x512xf32> -> vector<4x512xf32>
    %34 = vector.broadcast %2 : vector<4x1xf32> to vector<4x512xf32>
    %35 = arith.addf %33, %34 : vector<4x512xf32>
    %c511_i32 = arith.constant 511 : i32
    %36 = tpu.dynamic_rotate %0 by %c511_i32 dim 1 : vector<4x512xf32>, i32 -> vector<4x512xf32>
    %37 = vector.broadcast %27 : vector<1x512xf32> to vector<4x512xf32>
    %38 = arith.mulf %36, %37 : vector<4x512xf32>
    %39 = vector.extract_strided_slice %1 {offsets = [0, 13], sizes = [4, 8], strides = [1, 1]} : vector<4x85xf32> to vector<4x8xf32>
    %40 = tpu.concatenate %38, %0 in 0 : vector<4x512xf32>, vector<4x512xf32> -> vector<8x512xf32>
    %cst_4 = arith.constant dense<0.000000e+00> : vector<4x512xf32>
    %41 = tpu.matmul %39, %40, %cst_4 {dimension_numbers = #tpu.dot_dimension_numbers<[1], [0], [0], [1], [0, 0, 1, 1], [], []>} : vector<4x8xf32>, vector<8x512xf32>, vector<4x512xf32> -> vector<4x512xf32>
    %42 = vector.broadcast %2 : vector<4x1xf32> to vector<4x512xf32>
    %43 = arith.addf %41, %42 : vector<4x512xf32>
    %c496_i32 = arith.constant 496 : i32
    %44 = tpu.dynamic_rotate %0 by %c496_i32 dim 1 : vector<4x512xf32>, i32 -> vector<4x512xf32>
    %45 = vector.broadcast %19 : vector<1x512xf32> to vector<4x512xf32>
    %46 = arith.mulf %44, %45 : vector<4x512xf32>
    %47 = vector.extract_strided_slice %1 {offsets = [0, 21], sizes = [4, 8], strides = [1, 1]} : vector<4x85xf32> to vector<4x8xf32>
    %48 = tpu.concatenate %46, %0 in 0 : vector<4x512xf32>, vector<4x512xf32> -> vector<8x512xf32>
    %cst_5 = arith.constant dense<0.000000e+00> : vector<4x512xf32>
    %49 = tpu.matmul %47, %48, %cst_5 {dimension_numbers = #tpu.dot_dimension_numbers<[1], [0], [0], [1], [0, 0, 1, 1], [], []>} : vector<4x8xf32>, vector<8x512xf32>, vector<4x512xf32> -> vector<4x512xf32>
    %50 = vector.broadcast %2 : vector<4x1xf32> to vector<4x512xf32>
    %51 = arith.addf %49, %50 : vector<4x512xf32>
    %c495_i32 = arith.constant 495 : i32
    %52 = tpu.dynamic_rotate %0 by %c495_i32 dim 1 : vector<4x512xf32>, i32 -> vector<4x512xf32>
    %53 = arith.mulf %19, %27 : vector<1x512xf32>
    %54 = vector.broadcast %53 : vector<1x512xf32> to vector<4x512xf32>
    %55 = arith.mulf %52, %54 : vector<4x512xf32>
    %56 = vector.extract_strided_slice %1 {offsets = [0, 29], sizes = [4, 16], strides = [1, 1]} : vector<4x85xf32> to vector<4x16xf32>
    %57 = tpu.concatenate %55, %46, %38, %0 in 0 : vector<4x512xf32>, vector<4x512xf32>, vector<4x512xf32>, vector<4x512xf32> -> vector<16x512xf32>
    %cst_6 = arith.constant dense<0.000000e+00> : vector<4x512xf32>
    %58 = tpu.matmul %56, %57, %cst_6 {dimension_numbers = #tpu.dot_dimension_numbers<[1], [0], [0], [1], [0, 0, 1, 1], [], []>} : vector<4x16xf32>, vector<16x512xf32>, vector<4x512xf32> -> vector<4x512xf32>
    %59 = vector.broadcast %2 : vector<4x1xf32> to vector<4x512xf32>
    %60 = arith.addf %58, %59 : vector<4x512xf32>
    %cst_7 = arith.constant dense<0.000000e+00> : vector<4xf32>
    %61 = vector.multi_reduction <add>, %35, %cst_7 [1] : vector<4x512xf32> to vector<4xf32>
    %62 = vector.shape_cast %61 : vector<4xf32> to vector<4x1xf32>
    %cst_8 = arith.constant 0.000000e+00 : f32
    %63 = vector.broadcast %cst_8 : f32 to vector<4x1xf32>
    %64 = arith.addf %63, %62 : vector<4x1xf32>
    %cst_9 = arith.constant dense<0.000000e+00> : vector<4xf32>
    %65 = vector.multi_reduction <add>, %43, %cst_9 [1] : vector<4x512xf32> to vector<4xf32>
    %66 = vector.shape_cast %65 : vector<4xf32> to vector<4x1xf32>
    %67 = arith.addf %64, %66 : vector<4x1xf32>
    %cst_10 = arith.constant dense<0.000000e+00> : vector<4xf32>
    %68 = vector.multi_reduction <add>, %51, %cst_10 [1] : vector<4x512xf32> to vector<4xf32>
    %69 = vector.shape_cast %68 : vector<4xf32> to vector<4x1xf32>
    %70 = arith.addf %67, %69 : vector<4x1xf32>
    %cst_11 = arith.constant dense<0.000000e+00> : vector<4xf32>
    %71 = vector.multi_reduction <add>, %60, %cst_11 [1] : vector<4x512xf32> to vector<4xf32>
    %72 = vector.shape_cast %71 : vector<4xf32> to vector<4x1xf32>
    %73 = arith.addf %70, %72 : vector<4x1xf32>
    %74 = arith.mulf %35, %35 : vector<4x512xf32>
    %cst_12 = arith.constant dense<0.000000e+00> : vector<4xf32>
    %75 = vector.multi_reduction <add>, %74, %cst_12 [1] : vector<4x512xf32> to vector<4xf32>
    %76 = vector.shape_cast %75 : vector<4xf32> to vector<4x1xf32>
    %cst_13 = arith.constant 0.000000e+00 : f32
    %77 = vector.broadcast %cst_13 : f32 to vector<4x1xf32>
    %78 = arith.addf %77, %76 : vector<4x1xf32>
    %79 = arith.mulf %43, %43 : vector<4x512xf32>
    %cst_14 = arith.constant dense<0.000000e+00> : vector<4xf32>
    %80 = vector.multi_reduction <add>, %79, %cst_14 [1] : vector<4x512xf32> to vector<4xf32>
    %81 = vector.shape_cast %80 : vector<4xf32> to vector<4x1xf32>
    %82 = arith.addf %78, %81 : vector<4x1xf32>
    %83 = arith.mulf %51, %51 : vector<4x512xf32>
    %cst_15 = arith.constant dense<0.000000e+00> : vector<4xf32>
    %84 = vector.multi_reduction <add>, %83, %cst_15 [1] : vector<4x512xf32> to vector<4xf32>
    %85 = vector.shape_cast %84 : vector<4xf32> to vector<4x1xf32>
    %86 = arith.addf %82, %85 : vector<4x1xf32>
    %87 = arith.mulf %60, %60 : vector<4x512xf32>
    %cst_16 = arith.constant dense<0.000000e+00> : vector<4xf32>
    %88 = vector.multi_reduction <add>, %87, %cst_16 [1] : vector<4x512xf32> to vector<4xf32>
    %89 = vector.shape_cast %88 : vector<4xf32> to vector<4x1xf32>
    %90 = arith.addf %86, %89 : vector<4x1xf32>
    %cst_17 = arith.constant 2.048000e+03 : f32
    %91 = vector.broadcast %cst_17 : f32 to vector<4x1xf32>
    %92 = arith.divf %73, %91 : vector<4x1xf32>
    %cst_18 = arith.constant 2.048000e+03 : f32
    %93 = vector.broadcast %cst_18 : f32 to vector<4x1xf32>
    %94 = arith.divf %90, %93 : vector<4x1xf32>
    %95 = arith.mulf %92, %92 : vector<4x1xf32>
    %96 = arith.subf %94, %95 : vector<4x1xf32>
    %cst_19 = arith.constant 9.99999974E-6 : f32
    %97 = vector.broadcast %cst_19 : f32 to vector<4x1xf32>
    %98 = arith.addf %96, %97 : vector<4x1xf32>
    %99 = math.rsqrt %98 : vector<4x1xf32>
    %100 = arith.mulf %3, %99 : vector<4x1xf32>
    %101 = arith.mulf %92, %100 : vector<4x1xf32>
    %102 = arith.subf %4, %101 : vector<4x1xf32>
    %103 = vector.broadcast %100 : vector<4x1xf32> to vector<4x512xf32>
    %104 = arith.mulf %103, %35 : vector<4x512xf32>
    %105 = vector.broadcast %102 : vector<4x1xf32> to vector<4x512xf32>
    %106 = arith.addf %104, %105 : vector<4x512xf32>
    %cst_20 = arith.constant 0.000000e+00 : f32
    %107 = vector.broadcast %cst_20 : f32 to vector<4x512xf32>
    %108 = arith.cmpf oge, %106, %107 : vector<4x512xf32>
    %cst_21 = arith.constant 2.500000e-01 : f32
    %109 = vector.broadcast %cst_21 : f32 to vector<4x512xf32>
    %110 = arith.mulf %109, %106 : vector<4x512xf32>
    %111 = arith.select %108, %106, %110 : vector<4x512xi1>, vector<4x512xf32>
    %112 = vector.broadcast %100 : vector<4x1xf32> to vector<4x512xf32>
    %113 = arith.mulf %112, %43 : vector<4x512xf32>
    %114 = vector.broadcast %102 : vector<4x1xf32> to vector<4x512xf32>
    %115 = arith.addf %113, %114 : vector<4x512xf32>
    %cst_22 = arith.constant 0.000000e+00 : f32
    %116 = vector.broadcast %cst_22 : f32 to vector<4x512xf32>
    %117 = arith.cmpf oge, %115, %116 : vector<4x512xf32>
    %cst_23 = arith.constant 2.500000e-01 : f32
    %118 = vector.broadcast %cst_23 : f32 to vector<4x512xf32>
    %119 = arith.mulf %118, %115 : vector<4x512xf32>
    %120 = arith.select %117, %115, %119 : vector<4x512xi1>, vector<4x512xf32>
    %121 = vector.broadcast %100 : vector<4x1xf32> to vector<4x512xf32>
    %122 = arith.mulf %121, %51 : vector<4x512xf32>
    %123 = vector.broadcast %102 : vector<4x1xf32> to vector<4x512xf32>
    %124 = arith.addf %122, %123 : vector<4x512xf32>
    %cst_24 = arith.constant 0.000000e+00 : f32
    %125 = vector.broadcast %cst_24 : f32 to vector<4x512xf32>
    %126 = arith.cmpf oge, %124, %125 : vector<4x512xf32>
    %cst_25 = arith.constant 2.500000e-01 : f32
    %127 = vector.broadcast %cst_25 : f32 to vector<4x512xf32>
    %128 = arith.mulf %127, %124 : vector<4x512xf32>
    %129 = arith.select %126, %124, %128 : vector<4x512xi1>, vector<4x512xf32>
    %130 = vector.broadcast %100 : vector<4x1xf32> to vector<4x512xf32>
    %131 = arith.mulf %130, %60 : vector<4x512xf32>
    %132 = vector.broadcast %102 : vector<4x1xf32> to vector<4x512xf32>
    %133 = arith.addf %131, %132 : vector<4x512xf32>
    %cst_26 = arith.constant 0.000000e+00 : f32
    %134 = vector.broadcast %cst_26 : f32 to vector<4x512xf32>
    %135 = arith.cmpf oge, %133, %134 : vector<4x512xf32>
    %cst_27 = arith.constant 2.500000e-01 : f32
    %136 = vector.broadcast %cst_27 : f32 to vector<4x512xf32>
    %137 = arith.mulf %136, %133 : vector<4x512xf32>
    %138 = arith.select %135, %133, %137 : vector<4x512xi1>, vector<4x512xf32>
    %139 = vector.extract_strided_slice %1 {offsets = [0, 45], sizes = [4, 36], strides = [1, 1]} : vector<4x85xf32> to vector<4x36xf32>
    %c1_i32_28 = arith.constant 1 : i32
    %140 = tpu.dynamic_rotate %138 by %c1_i32_28 dim 1 : vector<4x512xf32>, i32 -> vector<4x512xf32>
    %141 = vector.broadcast %31 : vector<1x512xf32> to vector<4x512xf32>
    %142 = arith.mulf %140, %141 : vector<4x512xf32>
    %c1_i32_29 = arith.constant 1 : i32
    %143 = tpu.dynamic_rotate %120 by %c1_i32_29 dim 1 : vector<4x512xf32>, i32 -> vector<4x512xf32>
    %144 = vector.broadcast %31 : vector<1x512xf32> to vector<4x512xf32>
    %145 = arith.mulf %143, %144 : vector<4x512xf32>
    %c16_i32_30 = arith.constant 16 : i32
    %146 = tpu.dynamic_rotate %138 by %c16_i32_30 dim 1 : vector<4x512xf32>, i32 -> vector<4x512xf32>
    %147 = vector.broadcast %23 : vector<1x512xf32> to vector<4x512xf32>
    %148 = arith.mulf %146, %147 : vector<4x512xf32>
    %c16_i32_31 = arith.constant 16 : i32
    %149 = tpu.dynamic_rotate %129 by %c16_i32_31 dim 1 : vector<4x512xf32>, i32 -> vector<4x512xf32>
    %150 = vector.broadcast %23 : vector<1x512xf32> to vector<4x512xf32>
    %151 = arith.mulf %149, %150 : vector<4x512xf32>
    %c17_i32 = arith.constant 17 : i32
    %152 = tpu.dynamic_rotate %138 by %c17_i32 dim 1 : vector<4x512xf32>, i32 -> vector<4x512xf32>
    %153 = arith.mulf %23, %31 : vector<1x512xf32>
    %154 = vector.broadcast %153 : vector<1x512xf32> to vector<4x512xf32>
    %155 = arith.mulf %152, %154 : vector<4x512xf32>
    %156 = tpu.concatenate %138, %129, %142, %120, %111, %145, %148, %151, %155 in 0 : vector<4x512xf32>, vector<4x512xf32>, vector<4x512xf32>, vector<4x512xf32>, vector<4x512xf32>, vector<4x512xf32>, vector<4x512xf32>, vector<4x512xf32>, vector<4x512xf32> -> vector<36x512xf32>
    %cst_32 = arith.constant dense<0.000000e+00> : vector<4x512xf32>
    %157 = tpu.matmul %139, %156, %cst_32 {dimension_numbers = #tpu.dot_dimension_numbers<[1], [0], [0], [1], [0, 0, 1, 1], [], []>} : vector<4x36xf32>, vector<36x512xf32>, vector<4x512xf32> -> vector<4x512xf32>
    %c511_i32_33 = arith.constant 511 : i32
    %158 = tpu.dynamic_rotate %129 by %c511_i32_33 dim 1 : vector<4x512xf32>, i32 -> vector<4x512xf32>
    %159 = vector.broadcast %27 : vector<1x512xf32> to vector<4x512xf32>
    %160 = arith.mulf %158, %159 : vector<4x512xf32>
    %c511_i32_34 = arith.constant 511 : i32
    %161 = tpu.dynamic_rotate %111 by %c511_i32_34 dim 1 : vector<4x512xf32>, i32 -> vector<4x512xf32>
    %162 = vector.broadcast %27 : vector<1x512xf32> to vector<4x512xf32>
    %163 = arith.mulf %161, %162 : vector<4x512xf32>
    %c15_i32_35 = arith.constant 15 : i32
    %164 = tpu.dynamic_rotate %129 by %c15_i32_35 dim 1 : vector<4x512xf32>, i32 -> vector<4x512xf32>
    %165 = arith.mulf %23, %27 : vector<1x512xf32>
    %166 = vector.broadcast %165 : vector<1x512xf32> to vector<4x512xf32>
    %167 = arith.mulf %164, %166 : vector<4x512xf32>
    %168 = tpu.concatenate %160, %138, %129, %163, %120, %111, %167, %148, %151 in 0 : vector<4x512xf32>, vector<4x512xf32>, vector<4x512xf32>, vector<4x512xf32>, vector<4x512xf32>, vector<4x512xf32>, vector<4x512xf32>, vector<4x512xf32>, vector<4x512xf32> -> vector<36x512xf32>
    %cst_36 = arith.constant dense<0.000000e+00> : vector<4x512xf32>
    %169 = tpu.matmul %139, %168, %cst_36 {dimension_numbers = #tpu.dot_dimension_numbers<[1], [0], [0], [1], [0, 0, 1, 1], [], []>} : vector<4x36xf32>, vector<36x512xf32>, vector<4x512xf32> -> vector<4x512xf32>
    %c496_i32_37 = arith.constant 496 : i32
    %170 = tpu.dynamic_rotate %120 by %c496_i32_37 dim 1 : vector<4x512xf32>, i32 -> vector<4x512xf32>
    %171 = vector.broadcast %19 : vector<1x512xf32> to vector<4x512xf32>
    %172 = arith.mulf %170, %171 : vector<4x512xf32>
    %c496_i32_38 = arith.constant 496 : i32
    %173 = tpu.dynamic_rotate %111 by %c496_i32_38 dim 1 : vector<4x512xf32>, i32 -> vector<4x512xf32>
    %174 = vector.broadcast %19 : vector<1x512xf32> to vector<4x512xf32>
    %175 = arith.mulf %173, %174 : vector<4x512xf32>
    %c497_i32 = arith.constant 497 : i32
    %176 = tpu.dynamic_rotate %120 by %c497_i32 dim 1 : vector<4x512xf32>, i32 -> vector<4x512xf32>
    %177 = arith.mulf %19, %31 : vector<1x512xf32>
    %178 = vector.broadcast %177 : vector<1x512xf32> to vector<4x512xf32>
    %179 = arith.mulf %176, %178 : vector<4x512xf32>
    %180 = tpu.concatenate %172, %175, %179, %138, %129, %142, %120, %111, %145 in 0 : vector<4x512xf32>, vector<4x512xf32>, vector<4x512xf32>, vector<4x512xf32>, vector<4x512xf32>, vector<4x512xf32>, vector<4x512xf32>, vector<4x512xf32>, vector<4x512xf32> -> vector<36x512xf32>
    %cst_39 = arith.constant dense<0.000000e+00> : vector<4x512xf32>
    %181 = tpu.matmul %139, %180, %cst_39 {dimension_numbers = #tpu.dot_dimension_numbers<[1], [0], [0], [1], [0, 0, 1, 1], [], []>} : vector<4x36xf32>, vector<36x512xf32>, vector<4x512xf32> -> vector<4x512xf32>
    %c495_i32_40 = arith.constant 495 : i32
    %182 = tpu.dynamic_rotate %111 by %c495_i32_40 dim 1 : vector<4x512xf32>, i32 -> vector<4x512xf32>
    %183 = arith.mulf %19, %27 : vector<1x512xf32>
    %184 = vector.broadcast %183 : vector<1x512xf32> to vector<4x512xf32>
    %185 = arith.mulf %182, %184 : vector<4x512xf32>
    %186 = tpu.concatenate %185, %172, %175, %160, %138, %129, %163, %120, %111 in 0 : vector<4x512xf32>, vector<4x512xf32>, vector<4x512xf32>, vector<4x512xf32>, vector<4x512xf32>, vector<4x512xf32>, vector<4x512xf32>, vector<4x512xf32>, vector<4x512xf32> -> vector<36x512xf32>
    %cst_41 = arith.constant dense<0.000000e+00> : vector<4x512xf32>
    %187 = tpu.matmul %139, %186, %cst_41 {dimension_numbers = #tpu.dot_dimension_numbers<[1], [0], [0], [1], [0, 0, 1, 1], [], []>} : vector<4x36xf32>, vector<36x512xf32>, vector<4x512xf32> -> vector<4x512xf32>
    %188 = tpu.concatenate %157, %169, %181, %187 in 1 : vector<4x512xf32>, vector<4x512xf32>, vector<4x512xf32>, vector<4x512xf32> -> vector<4x2048xf32>
    %189 = vector.broadcast %5 : vector<4x1xf32> to vector<4x2048xf32>
    %190 = arith.addf %188, %189 : vector<4x2048xf32>
    %cst_42 = arith.constant dense<0.000000e+00> : vector<4xf32>
    %191 = vector.multi_reduction <add>, %190, %cst_42 [1] : vector<4x2048xf32> to vector<4xf32>
    %192 = vector.shape_cast %191 : vector<4xf32> to vector<4x1xf32>
    %cst_43 = arith.constant 2.048000e+03 : f32
    %193 = vector.broadcast %cst_43 : f32 to vector<4x1xf32>
    %194 = arith.divf %192, %193 : vector<4x1xf32>
    %195 = arith.mulf %190, %190 : vector<4x2048xf32>
    %cst_44 = arith.constant dense<0.000000e+00> : vector<4xf32>
    %196 = vector.multi_reduction <add>, %195, %cst_44 [1] : vector<4x2048xf32> to vector<4xf32>
    %197 = vector.shape_cast %196 : vector<4xf32> to vector<4x1xf32>
    %cst_45 = arith.constant 2.048000e+03 : f32
    %198 = vector.broadcast %cst_45 : f32 to vector<4x1xf32>
    %199 = arith.divf %197, %198 : vector<4x1xf32>
    %200 = arith.mulf %194, %194 : vector<4x1xf32>
    %201 = arith.subf %199, %200 : vector<4x1xf32>
    %cst_46 = arith.constant 9.99999974E-6 : f32
    %202 = vector.broadcast %cst_46 : f32 to vector<4x1xf32>
    %203 = arith.addf %201, %202 : vector<4x1xf32>
    %204 = math.rsqrt %203 : vector<4x1xf32>
    %205 = arith.mulf %6, %204 : vector<4x1xf32>
    %206 = arith.mulf %194, %205 : vector<4x1xf32>
    %207 = arith.subf %7, %206 : vector<4x1xf32>
    %208 = vector.broadcast %205 : vector<4x1xf32> to vector<4x2048xf32>
    %209 = arith.mulf %208, %190 : vector<4x2048xf32>
    %210 = vector.broadcast %207 : vector<4x1xf32> to vector<4x2048xf32>
    %211 = arith.addf %209, %210 : vector<4x2048xf32>
    %212 = vector.extract_strided_slice %1 {offsets = [0, 81], sizes = [4, 4], strides = [1, 1]} : vector<4x85xf32> to vector<4x4xf32>
    %cst_47 = arith.constant dense<0.000000e+00> : vector<4x512xf32>
    %213 = tpu.matmul %212, %0, %cst_47 {dimension_numbers = #tpu.dot_dimension_numbers<[1], [0], [0], [1], [0, 0, 1, 1], [], []>} : vector<4x4xf32>, vector<4x512xf32>, vector<4x512xf32> -> vector<4x512xf32>
    %214 = vector.broadcast %8 : vector<4x1xf32> to vector<4x512xf32>
    %215 = arith.addf %213, %214 : vector<4x512xf32>
    %cst_48 = arith.constant dense<0.000000e+00> : vector<4xf32>
    %216 = vector.multi_reduction <add>, %215, %cst_48 [1] : vector<4x512xf32> to vector<4xf32>
    %217 = vector.shape_cast %216 : vector<4xf32> to vector<4x1xf32>
    %cst_49 = arith.constant 1.536000e+03 : f32
    %218 = vector.broadcast %cst_49 : f32 to vector<4x1xf32>
    %219 = arith.mulf %218, %8 : vector<4x1xf32>
    %220 = arith.addf %217, %219 : vector<4x1xf32>
    %221 = arith.mulf %215, %215 : vector<4x512xf32>
    %cst_50 = arith.constant dense<0.000000e+00> : vector<4xf32>
    %222 = vector.multi_reduction <add>, %221, %cst_50 [1] : vector<4x512xf32> to vector<4xf32>
    %223 = vector.shape_cast %222 : vector<4xf32> to vector<4x1xf32>
    %cst_51 = arith.constant 1.536000e+03 : f32
    %224 = vector.broadcast %cst_51 : f32 to vector<4x1xf32>
    %225 = arith.mulf %224, %8 : vector<4x1xf32>
    %226 = arith.mulf %225, %8 : vector<4x1xf32>
    %227 = arith.addf %223, %226 : vector<4x1xf32>
    %cst_52 = arith.constant 2.048000e+03 : f32
    %228 = vector.broadcast %cst_52 : f32 to vector<4x1xf32>
    %229 = arith.divf %220, %228 : vector<4x1xf32>
    %cst_53 = arith.constant 2.048000e+03 : f32
    %230 = vector.broadcast %cst_53 : f32 to vector<4x1xf32>
    %231 = arith.divf %227, %230 : vector<4x1xf32>
    %232 = arith.mulf %229, %229 : vector<4x1xf32>
    %233 = arith.subf %231, %232 : vector<4x1xf32>
    %cst_54 = arith.constant 9.99999974E-6 : f32
    %234 = vector.broadcast %cst_54 : f32 to vector<4x1xf32>
    %235 = arith.addf %233, %234 : vector<4x1xf32>
    %236 = math.rsqrt %235 : vector<4x1xf32>
    %237 = arith.mulf %9, %236 : vector<4x1xf32>
    %238 = arith.mulf %229, %237 : vector<4x1xf32>
    %239 = arith.subf %10, %238 : vector<4x1xf32>
    %240 = vector.broadcast %237 : vector<4x1xf32> to vector<4x512xf32>
    %241 = arith.mulf %240, %215 : vector<4x512xf32>
    %242 = vector.broadcast %239 : vector<4x1xf32> to vector<4x512xf32>
    %243 = arith.addf %241, %242 : vector<4x512xf32>
    %244 = arith.mulf %237, %8 : vector<4x1xf32>
    %245 = arith.addf %244, %239 : vector<4x1xf32>
    %246 = vector.extract_strided_slice %211 {offsets = [0, 0], sizes = [4, 512], strides = [1, 1]} : vector<4x2048xf32> to vector<4x512xf32>
    %247 = arith.addf %246, %243 : vector<4x512xf32>
    %248 = vector.extract_strided_slice %211 {offsets = [0, 512], sizes = [4, 1536], strides = [1, 1]} : vector<4x2048xf32> to vector<4x1536xf32>
    %249 = vector.broadcast %245 : vector<4x1xf32> to vector<4x1536xf32>
    %250 = arith.addf %248, %249 : vector<4x1536xf32>
    %cst_55 = arith.constant 0.000000e+00 : f32
    %251 = vector.broadcast %cst_55 : f32 to vector<4x512xf32>
    %252 = arith.cmpf oge, %247, %251 : vector<4x512xf32>
    %cst_56 = arith.constant 2.500000e-01 : f32
    %253 = vector.broadcast %cst_56 : f32 to vector<4x512xf32>
    %254 = arith.mulf %253, %247 : vector<4x512xf32>
    %255 = arith.select %252, %247, %254 : vector<4x512xi1>, vector<4x512xf32>
    %c0_57 = arith.constant 0 : index
    %c0_58 = arith.constant 0 : index
    %256 = vector.load %arg3[%c0_57, %c0_58] : memref<4x2048xf32, #tpu.memory_space<vmem>>, vector<4x512xf32>
    tpu.vector_store %arg3[%c0_57, %c0_58], %255 {strides = array<i32>} : memref<4x2048xf32, #tpu.memory_space<vmem>>, vector<4x512xf32>,
    %cst_59 = arith.constant 0.000000e+00 : f32
    %257 = vector.broadcast %cst_59 : f32 to vector<4x1536xf32>
    %258 = arith.cmpf oge, %250, %257 : vector<4x1536xf32>
    %cst_60 = arith.constant 2.500000e-01 : f32
    %259 = vector.broadcast %cst_60 : f32 to vector<4x1536xf32>
    %260 = arith.mulf %259, %250 : vector<4x1536xf32>
    %261 = arith.select %258, %250, %260 : vector<4x1536xi1>, vector<4x1536xf32>
    %c0_61 = arith.constant 0 : index
    %c512 = arith.constant 512 : index
    %262 = vector.load %arg3[%c0_61, %c512] : memref<4x2048xf32, #tpu.memory_space<vmem>>, vector<4x1536xf32>
    tpu.vector_store %arg3[%c0_61, %c512], %261 {strides = array<i32>} : memref<4x2048xf32, #tpu.memory_space<vmem>>, vector<4x1536xf32>,
    return
  }
  func.func @transform_0(%arg0: i32) -> (i32, i32) {
    %c0_i32 = arith.constant 0 : i32
    %c0_i32_0 = arith.constant 0 : i32
    %c0_i32_1 = arith.constant 0 : i32
    return %c0_i32, %c0_i32_0 : i32, i32
  }
  func.func @transform_1(%arg0: i32) -> (i32, i32) {
    %c0_i32 = arith.constant 0 : i32
    %c0_i32_0 = arith.constant 0 : i32
    %c0_i32_1 = arith.constant 0 : i32
    return %c0_i32, %c0_i32_0 : i32, i32
  }
  func.func @transform_2(%arg0: i32) -> (i32, i32) {
    %c0_i32 = arith.constant 0 : i32
    %c0_i32_0 = arith.constant 0 : i32
    %c0_i32_1 = arith.constant 0 : i32
    return %c0_i32, %c0_i32_0 : i32, i32
  }
}

</mosaic_0001>

<bundles_post_ra>
// kernel: tpu_custom_call.1
= control target key start
LH: loop header
LB: loop body
LE: loop exit
PB: predicated region body
PF: predicated region fallthrough
CT: control target
= control target key end

     0   :  { %7 = vsyncpa [#allocation3], 0  ;;  %s4120_s0 = inlined_call_operand.hbm [shape: f32[4,512], index: 0, kind: input, shape index: {}]   ;;  %s4121_s1 = inlined_call_operand.hbm [shape: f32[4,85], index: 1, kind: input, shape index: {}]   ;;  %s4122_s2 = inlined_call_operand.hbm [shape: f32[4,2048], index: 2, kind: output, shape index: {}]  }
   0x1   :  { %8 = vsyncpa [#allocation6], 0 }
   0x2   :  { %9 = vsyncpa [#allocation4], 0  ;;  %s2762_s9 = smov [#allocation2]   ;;  %s2763_s11 = smov [#allocation5]  }
   0x3   :  { %s16_s10 = sshll.u32 %s2762_s9, 4  ;;  %s26_s12 = sshll.u32 %s2763_s11, 4  ;;  %s17_s10 = int_to_ptr.vmem [resolvable:$true] %s16_s10  ;;  %s27_s12 = int_to_ptr.vmem [resolvable:$true] %s26_s12 }
   0x4   :  { %s2690_s15 = scalar_lea.hbm %s4120_s0, 256 }
   0x5   :  { %p2691_p0 = scmp.ne.s32.totalorder %s4120_s0, %s2690_s15  ;;  %p2694_p1 = scmp.lt.u32.totalorder %s2690_s15, %s4120_s0 }
   0x7   :  { %p2696_p2 = pnand %p2694_p1, %p2691_p0 }
   0x9   :  { %2699 = shalt.err (!%p2696_p2)
}
   0xa   :  { %s2700_s20 = scalar_lea.vmem %s17_s10, 256  ;;  %p2705_p4 = scmp.lt.s32.totalorder %s17_s10, %s17_s10 }
   0xb   :  { %p2701_p3 = scmp.ne.s32.totalorder %s17_s10, %s2700_s20  ;;  %p2706_p5 = scmp.lt.s32.totalorder %s2700_s20, %s2700_s20 }
   0xd   :  { %p2707_p6 = por %p2706_p5, %p2705_p4 }
   0xf   :  { %p2708_p7 = pnand %p2707_p6, %p2701_p3 }
  0x11   :  { %2711 = shalt.err (!%p2708_p7)
}
  0x12   :  { %19 = dma.hbm_to_vmem [thread:$0]  %s4120_s0, 256, %s17_s10, [#allocation3]  }
  0x13   :  { %s2712_s25 = scalar_lea.hbm %s4121_s1, 64 }
  0x14   :  { %p2713_p8 = scmp.ne.s32.totalorder %s4121_s1, %s2712_s25  ;;  %p2716_p9 = scmp.lt.u32.totalorder %s2712_s25, %s4121_s1 }
  0x16   :  { %p2718_p10 = pnand %p2716_p9, %p2713_p8 }
  0x18   :  { %2721 = shalt.err (!%p2718_p10)
}
  0x19   :  { %s2722_s30 = scalar_lea.vmem %s27_s12, 64  ;;  %p2727_p12 = scmp.lt.s32.totalorder %s27_s12, %s27_s12 }
  0x1a   :  { %p2723_p11 = scmp.ne.s32.totalorder %s27_s12, %s2722_s30  ;;  %p2728_p13 = scmp.lt.s32.totalorder %s2722_s30, %s2722_s30 }
  0x1c   :  { %p2729_p0 = por %p2728_p13, %p2727_p12 }
  0x1e   :  { %p2730_p1 = pnand %p2729_p0, %p2723_p11 }
  0x20   :  { %2733 = shalt.err (!%p2730_p1)
}
  0x21   :  { %29 = dma.hbm_to_vmem [thread:$0]  %s4121_s1, 64, %s27_s12, [#allocation6]  }
  0x22   :  { %2756 = dma.done.wait [#allocation3], 256  }
  0x23   :  { %2757 = vsyncadd [#allocation3], 4294967040 }
  0x24   :  { %2758 = dma.done.wait [#allocation6], 64  }
  0x25   :  { %2759 = vsyncadd [#allocation6], 4294967232  ;;  %v4125_v0 = vmov 0.0   ;;  %v2831_v1 = vld [vmem:[#allocation2 + $0x8] sm:$0xff]  ;;  %v2833_v2 = vld [vmem:[#allocation2] sm:$0xff]  ;;  %vm114_vm0 = vcmask 1043456   ;;  %v39_v7 = vlaneseq }
  0x26   :  { %187 = vmatprep.mubr.f32.mxu0 %v4125_v0  ;;  %258 = vmatprep.mubr.f32.mxu1 %v4125_v0  ;;  %s2765_s4 = smov 127   ;;  %v2841_v3 = vcombine.high %v2833_v2, %v2833_v2  ;;  %v2845_v4 = vcombine.high %v2831_v1, %v2831_v1  ;;  %v2847_v5 = vld [vmem:[#allocation5] sm:$0xf]  ;;  %s2766_s1 = smov 119   ;;  %v2769_v6 = vmov 0   ;;  %vm111_vm4 = vcmask 31744  }
  0x27   :  { %271 = vrot.lane.b32.xlu0 %v2831_v1, %s2765_s4  ;;  %267 = vrot.lane.b32.xlu1 %v2833_v2, %s2765_s4  ;;  %s2767_s5 = smov 112   ;;  %s2768_s6 = smov 111   ;;  %v2882_v8 = vand.u32 127, %v39_v7  ;;  %v2909_v21 = vcombine.low %v2833_v2, %v2833_v2  ;;  %v285_v40 = vcombine.low %v2831_v1, %v2831_v1  ;;  %vm294_vm11 = vcmask 64512  }
  0x28   :  { %4149 = vst [vmem:[#allocation11_spill] sm:$0xff] %v2841_v3  ;;  %4150 = vst [vmem:[#allocation12_spill] sm:$0xff] %v2845_v4  ;;  %2524 = vmatprep.subr.msk.mxu0 %vm114_vm0, %v2841_v3  ;;  %2527 = vmatprep.subr.msk.mxu1 %vm114_vm0, %v2845_v4  ;;  %s2770_s7 = smov 115   ;;  %s2771_s8 = smov 107   ;;  %vm645_vm12 = vcmask 130048  }
  0x29   :  { %2528 = vmatpush1.msk.msra.mxu1 %vm114_vm0, %v2831_v1  ;;  %2525 = vmatpush1.msk.msra.mxu0 %vm114_vm0, %v2833_v2  ;;  %s2772_s9 = smov 99   ;;  %v2885_v9 = vadd.s32 128, %v2882_v8  ;;  %v48_v10 = vand.u32 15, %v2882_v8  ;;  %v2890_v12 = vadd.s32 256, %v2882_v8  ;;  %v2898_v16 = vadd.s32 384, %v2882_v8  ;;  %s2775_s10 = smov 1  }
  0x2a   :  { %2666 = vset.pattern.permute.xlu0 %v2769_v6  ;;  %vm275_vm3 = vcmp.lt.s32.totalorder %v2882_v8, 127  ;;  %vm447_vm6 = vcmp.lt.s32.totalorder %v2882_v8, 112  ;;  %vm614_vm9 = vcmp.lt.s32.totalorder %v2882_v8, 111  ;;  %s2776_s11 = smov 83   ;;  %s2777_s12 = smov 16  }
  0x2b   :  { %105 = vrot.lane.b32.xlu1 %v2847_v5, %s2766_s1  ;;  %269 = vrot.lane.b32.xlu0 %v2841_v3, %s2765_s4  ;;  %v49_v11 = vand.u32 15, %v2885_v9  ;;  %vm76_vm1 = vcmp.lt.s32.totalorder %v48_v10, 15  ;;  %v45_v15 = vand.u32 255, %v2885_v9  ;;  %v50_v22 = vand.u32 15, %v2890_v12  ;;  %s2778_s13 = smov 17   ;;  %s2779_s14 = smov 15  }
  0x2c   :  { %v2902_v17 = vsel %vm76_vm1, 1.0, %v4125_v0  ;;  %v51_v23 = vand.u32 15, %v2898_v16  ;;  %v47_v41 = vand.u32 255, %v2898_v16  ;;  %s2780_s15 = smov 113   ;;  %s2781_s16 = smov 47  }
  0x2d   :  { %vm77_vm2 = vcmp.lt.s32.totalorder %v49_v11, 15  ;;  %vm53_vm5 = vcmp.lt.s32.totalorder %v45_v15, 240  ;;  %vm78_vm7 = vcmp.lt.s32.totalorder %v50_v22, 15  ;;  %s2785_s17 = smov 2   ;;  %s2789_s18 = smov [#allocation7]  }
  0x2e   :  { %v2905_v18 = vsel %vm77_vm2, 1.0, %v4125_v0  ;;  %v2925_v28 = vsel %vm53_vm5, 1.0, %v4125_v0  ;;  %vm79_vm8 = vcmp.lt.s32.totalorder %v51_v23, 15  ;;  %v2945_v35 = vsel %vm78_vm7, 1.0, %v4125_v0  ;;  %s2502_s19 = sshll.u32 %s2789_s18, 4  ;;  %s2503_s19 = int_to_ptr.vmem [resolvable:$true] %s2502_s19 }
  0x2f   :  { %443 = vrot.lane.b32.xlu1 %v2831_v1, %s2767_s5  ;;  %441 = vrot.lane.b32.xlu0 %v2841_v3, %s2767_s5  ;;  %v2948_v36 = vsel %vm79_vm8, 1.0, %v4125_v0  ;;  %v2964_v46 = vmul.f32 %v2905_v18, %v2925_v28  ;;  %vm55_vm10 = vcmp.lt.s32.totalorder %v47_v41, 240  ;;  %s2734_s20 = scalar_lea.vmem %s2503_s19, 1024  ;;  %p2739_p3 = scmp.lt.s32.totalorder %s2503_s19, %s2503_s19 }
  0x30   :  { %v2973_v54 = vsel %vm55_vm10, 1.0, %v4125_v0  ;;  %p2735_p2 = scmp.ne.s32.totalorder %s2503_s19, %s2734_s20  ;;  %p2740_p4 = scmp.lt.s32.totalorder %s2734_s20, %s2734_s20 }
  0x31   :  { %4151 = vst [vmem:[#allocation13_spill] sm:$0xff] %v2964_v46  ;;  %4152 = vst [vmem:[#allocation14_spill] sm:$0xff] %v2973_v54  ;;  %v2983_v60 = vmul.f32 %v2948_v36, %v2973_v54 }
  0x32   :  { %p2741_p5 = por %p2740_p4, %p2739_p3 }
  0x33   :  { %608 = vrot.lane.b32.xlu1 %v2841_v3, %s2768_s6  ;;  %273 = vrot.lane.b32.xlu0 %v2845_v4, %s2765_s4  ;;  %4153 = vst [vmem:[#allocation15_spill] sm:$0xff] %v2983_v60 }
  0x34   :  { %p2742_p6 = pnand %p2741_p5, %p2735_p2 }
  0x37   :  { %439 = vrot.lane.b32.xlu1 %v2833_v2, %s2767_s5  ;;  %610 = vrot.lane.b32.xlu0 %v2831_v1, %s2768_s6 }
  0x3b   :  { %606 = vrot.lane.b32.xlu1 %v2833_v2, %s2768_s6  ;;  %445 = vrot.lane.b32.xlu0 %v2845_v4, %s2767_s5 }
  0x3f   :  { %612 = vrot.lane.b32.xlu1 %v2845_v4, %s2768_s6  ;;  %292 = vrot.lane.b32.xlu0 %v2847_v5, %s2770_s7 }
  0x43   :  { %460 = vrot.lane.b32.xlu0 %v2847_v5, %s2771_s8  ;;  %643 = vrot.lane.b32.xlu1 %v2847_v5, %s2772_s9 }
  0x47   :  { %102 = vperm.xlu0 %2666, %v2847_v5  }
  0x99   :  { %v272_v13 = vpop.permute.xlu0 %271  ;;  %v268_v14 = vpop.permute.xlu1 %267 }
  0x9d   :  { %v106_v19 = vpop.permute.xlu1 %105  ;;  %v270_v20 = vpop.permute.xlu0 %269 }
  0x9e   :  { %v277_v24 = vsel %vm275_vm3, %v270_v20, %v272_v13  ;;  %v278_v25 = vsel %vm275_vm3, %v268_v14, %v270_v20  ;;  %2526 = vmatmul.mubr.msk.f32.vlgmr.msra.gmra.mrb[0].mxu0 %vm111_vm4, %v106_v19  ;;  %2529 = vmatmul.mubr.msk.f32.vlgmr.msra.gmra.mrb[0].mxu1 %vm111_vm4, %v106_v19 }
  0x9f   :  { %v280_v26 = vmul.f32 %v2902_v17, %v278_v25  ;;  %v281_v27 = vmul.f32 %v2905_v18, %v277_v24  ;;  %432 = vmatprep.mubr.f32.mxu1 %v4125_v0  ;;  %361 = vmatprep.mubr.f32.mxu0 %v4125_v0 }
  0xa1   :  { %v444_v29 = vpop.permute.xlu1 %443  ;;  %v442_v30 = vpop.permute.xlu0 %441  ;;  %v2929_v31 = vsel %vm114_vm0, %v281_v27, %v2833_v2  ;;  %v2933_v32 = vsel %vm114_vm0, %v280_v26, %v2909_v21 }
  0xa2   :  { %v449_v33 = vsel %vm447_vm6, %v442_v30, %v444_v29  ;;  %297 = vmatprep.subr.mxu0 %v2929_v31 }
  0xa3   :  { %v453_v34 = vmul.f32 %v2925_v28, %v449_v33  ;;  %298 = vmatpush1.msra.mxu0 %v2933_v32 }
  0xa5   :  { %v609_v37 = vpop.permute.xlu1 %608  ;;  %v274_v38 = vpop.permute.xlu0 %273  ;;  %v457_v39 = vsel %vm114_vm0, %v453_v34, %v2833_v2  ;;  %v632_v53 = vrot.slane %v453_v34, 4 }
  0xa6   :  { %v276_v42 = vsel %vm275_vm3, %v272_v13, %v274_v38  ;;  %v279_v43 = vsel %vm275_vm3, %v274_v38, %v268_v14  ;;  %464 = vmatprep.subr.mxu0 %v457_v39 }
  0xa7   :  { %v282_v44 = vmul.f32 %v2945_v35, %v276_v42  ;;  %v283_v45 = vmul.f32 %v2948_v36, %v279_v43 }
  0xa9   :  { %v440_v47 = vpop.permute.xlu1 %439  ;;  %v611_v48 = vpop.permute.xlu0 %610  ;;  %v291_v49 = vsel %vm114_vm0, %v283_v45, %v2831_v1  ;;  %v290_v50 = vsel %vm114_vm0, %v282_v44, %v285_v40 }
  0xaa   :  { %v616_v51 = vsel %vm614_vm9, %v609_v37, %v611_v48  ;;  %368 = vmatprep.subr.mxu1 %v291_v49  ;;  %v450_v55 = vsel %vm447_vm6, %v440_v47, %v442_v30 }
  0xab   :  { %v624_v52 = vmul.f32 %v2964_v46, %v616_v51  ;;  %369 = vmatpush1.msra.mxu1 %v290_v50  ;;  %v631_v6 = vrot.slane %v450_v55, 4  ;;  %v456_v14 = vsel %vm114_vm0, %v450_v55, %v2909_v21 }
  0xad   :  { %v607_v56 = vpop.permute.xlu1 %606  ;;  %v446_v57 = vpop.permute.xlu0 %445  ;;  %v640_v61 = vsel %vm114_vm0, %v624_v52, %v632_v53 }
  0xae   :  { %v617_v58 = vsel %vm614_vm9, %v607_v56, %v609_v37  ;;  %v451_v59 = vsel %vm447_vm6, %v446_v57, %v440_v47  ;;  %v448_v63 = vsel %vm447_vm6, %v444_v29, %v446_v57  ;;  %v2566_v19 = vpack.c.bf16 %v2929_v31, %v640_v61 }
  0xaf   :  { %v623_v62 = vmul.f32 %v2902_v17, %v617_v58  ;;  %v455_v2 = vmul.f32 %v2973_v54, %v451_v59  ;;  %v633_v24 = vrot.slane %v448_v63, 4  ;;  %v458_v29 = vsel %vm114_vm0, %v448_v63, %v285_v40 }
  0xb1   :  { %v613_v7 = vpop.permute.xlu1 %612  ;;  %v293_v13 = vpop.permute.xlu0 %292  ;;  %v459_v15 = vsel %vm114_vm0, %v455_v2, %v2831_v1  ;;  %v639_v20 = vsel %vm114_vm0, %v623_v62, %v631_v6  ;;  %v634_v27 = vrot.slane %v455_v2, 4 }
  0xb2   :  { %v615_v25 = vsel %vm614_vm9, %v611_v48, %v613_v7  ;;  %v618_v26 = vsel %vm614_vm9, %v613_v7, %v607_v56  ;;  %2530 = vmatmul.mubr.msk.f32.vlgmr.msra.gmra.mrb[2].mxu0 %vm294_vm11, %v293_v13  ;;  %2531 = vmatmul.mubr.msk.f32.vlgmr.msra.gmra.mrb[2].mxu1 %vm294_vm11, %v293_v13  ;;  %v2568_v33 = vpack.c.bf16 %v2933_v32, %v639_v20 }
  0xb3   :  { %v625_v21 = vmul.f32 %v2945_v35, %v615_v25  ;;  %v626_v1 = vmul.f32 %v2983_v60, %v618_v26  ;;  %465 = vmatpush1.msra.mxu0 %v456_v14  ;;  %535 = vmatprep.subr.mxu1 %v459_v15 }
  0xb4   :  { %536 = vmatpush1.msra.mxu1 %v458_v29  ;;  %2567 = vmatprep.subr.bf16.mxu0 %v2566_v19 }
  0xb5   :  { %v641_v30 = vsel %vm114_vm0, %v625_v21, %v633_v24  ;;  %599 = vmatprep.mubr.f32.mxu1 %v4125_v0  ;;  %v461_v31 = vpop.permute.xlu0 %460  ;;  %528 = vmatprep.mubr.f32.mxu0 %v4125_v0  ;;  %v642_v34 = vsel %vm114_vm0, %v626_v1, %v634_v27  ;;  %v644_v39 = vpop.permute.xlu1 %643 }
  0xb6   :  { %2532 = vmatmul.mubr.msk.f32.vlgmr.msra.gmra.mrb[4].mxu0 %vm294_vm11, %v461_v31  ;;  %2533 = vmatmul.mubr.msk.f32.vlgmr.msra.gmra.mrb[4].mxu1 %vm294_vm11, %v461_v31  ;;  %v2570_v37 = vpack.c.bf16 %v291_v49, %v642_v34  ;;  %v2572_v38 = vpack.c.bf16 %v290_v50, %v641_v30 }
  0xb7   :  { %2569 = vmatpush1.bf16.msra.mxu0 %v2568_v33  ;;  %712 = vmatprep.mubr.f32.mxu0 %v4125_v0 }
  0xb8   :  { %2571 = vmatprep.subr.bf16.mxu1 %v2570_v37  ;;  %783 = vmatprep.mubr.f32.mxu1 %v4125_v0 }
  0xb9   :  { %2573 = vmatpush1.bf16.msra.mxu1 %v2572_v38 }
  0xba   :  { %2534 = vmatmul.mubr.msk.f32.vlgmr.msra.gmra.mrb[6].mxu0 %vm645_vm12, %v644_v39 }
  0xbb   :  { %1222 = vmatprep.mubr.f32.mxu0 %v4125_v0 }
  0xbc   :  { %2535 = vmatmul.mubr.msk.f32.vlgmr.msra.gmra.mrb[6].mxu1 %vm645_vm12, %v644_v39 }
  0xbd   :  { %1293 = vmatprep.mubr.f32.mxu1 %v4125_v0 }
  0xc6   :  { %v3016_v32 = vpop.permute.xlu0 %102 }
 0x171   :  { %v189_v40 = vpop.f32.mrb[0].mxu0  ;;  %v260_v41 = vpop.f32.mrb[0].mxu1 }
 0x172   :  { %v262_v42 = vpop.f32.mrb[1].mxu1  ;;  %v191_v43 = vpop.f32.mrb[1].mxu0  ;;  %v3019_v44 = vadd.f32 %v189_v40, %v3016_v32  ;;  %v3022_v45 = vadd.f32 %v260_v41, %v3016_v32 }
 0x173   :  { %v3025_v47 = vadd.f32 %v191_v43, %v3016_v32  ;;  %v3028_v48 = vadd.f32 %v262_v42, %v3016_v32 }
 0x174   :  { %v790_v49 = vsel %vm114_vm0, %v3019_v44, 0.0  ;;  %v830_v50 = vmul.f32 %v3019_v44, %v3019_v44  ;;  %v832_v53 = vmul.f32 %v3022_v45, %v3022_v45  ;;  %v793_v57 = vsel %vm114_vm0, %v3022_v45, 0.0 }
 0x175   :  { %v791_v51 = vsel %vm114_vm0, %v3025_v47, 0.0  ;;  %v831_v52 = vmul.f32 %v3025_v47, %v3025_v47  ;;  %v833_v58 = vmul.f32 %v3028_v48, %v3028_v48  ;;  %v795_v63 = vsel %vm114_vm0, %v3028_v48, 0.0 }
 0x176   :  { %v792_v55 = vadd.f32 %v791_v51, %v790_v49  ;;  %v834_v56 = vsel %vm114_vm0, %v830_v50, 0.0  ;;  %v837_v2 = vsel %vm114_vm0, %v832_v53, 0.0 }
 0x177   :  { %v835_v59 = vsel %vm114_vm0, %v831_v52, 0.0  ;;  %v839_v13 = vsel %vm114_vm0, %v833_v58, 0.0 }
 0x178   :  { %v794_v61 = vadd.f32 %v793_v57, %v792_v55  ;;  %v836_v62 = vadd.f32 %v835_v59, %v834_v56 }
 0x17a   :  { %v796_v6 = vadd.f32 %v795_v63, %v794_v61  ;;  %v838_v7 = vadd.f32 %v837_v2, %v836_v62 }
 0x17c   :  { %797 = vadd.xlane.f32.xlu1 %v796_v6  ;;  %v840_v14 = vadd.f32 %v839_v13, %v838_v7 }
 0x17e   :  { %841 = vadd.xlane.f32.xlu0 %v840_v14 }
 0x185   :  { %v363_v15 = vpop.f32.mrb[2].mxu0  ;;  %v434_v19 = vpop.f32.mrb[2].mxu1 }
 0x186   :  { %v3051_v20 = vadd.f32 %v363_v15, %v3016_v32  ;;  %v3054_v24 = vadd.f32 %v434_v19, %v3016_v32  ;;  %v365_v25 = vpop.f32.mrb[3].mxu0  ;;  %v436_v26 = vpop.f32.mrb[3].mxu1 }
 0x187   :  { %v3057_v27 = vadd.f32 %v365_v25, %v3016_v32  ;;  %v3060_v21 = vadd.f32 %v436_v26, %v3016_v32 }
 0x188   :  { %v800_v1 = vsel %vm114_vm0, %v3051_v20, 0.0  ;;  %v844_v29 = vmul.f32 %v3051_v20, %v3051_v20  ;;  %v846_v30 = vmul.f32 %v3054_v24, %v3054_v24  ;;  %v803_v38 = vsel %vm114_vm0, %v3054_v24, 0.0 }
 0x189   :  { %v801_v31 = vsel %vm114_vm0, %v3057_v27, 0.0  ;;  %v845_v33 = vmul.f32 %v3057_v27, %v3057_v27  ;;  %v530_v34 = vpop.f32.mrb[4].mxu0  ;;  %v601_v37 = vpop.f32.mrb[4].mxu1  ;;  %v805_v51 = vsel %vm114_vm0, %v3060_v21, 0.0  ;;  %v847_v52 = vmul.f32 %v3060_v21, %v3060_v21 }
 0x18a   :  { %v3075_v39 = vadd.f32 %v530_v34, %v3016_v32  ;;  %v3078_v40 = vadd.f32 %v601_v37, %v3016_v32  ;;  %v532_v41 = vpop.f32.mrb[5].mxu0  ;;  %v603_v42 = vpop.f32.mrb[5].mxu1  ;;  %v802_v43 = vadd.f32 %v801_v31, %v800_v1  ;;  %v848_v49 = vsel %vm114_vm0, %v844_v29, 0.0 }
 0x18b   :  { %v3082_v50 = vadd.f32 %v532_v41, %v3016_v32  ;;  %v849_v53 = vsel %vm114_vm0, %v845_v33, 0.0  ;;  %v3092_v56 = vadd.f32 %v603_v42, %v3016_v32  ;;  %v851_v58 = vsel %vm114_vm0, %v846_v30, 0.0 }
 0x18c   :  { %v810_v55 = vsel %vm114_vm0, %v3075_v39, 0.0  ;;  %v804_v57 = vadd.f32 %v803_v38, %v802_v43  ;;  %v858_v59 = vmul.f32 %v3075_v39, %v3075_v39  ;;  %v860_v61 = vmul.f32 %v3078_v40, %v3078_v40 }
 0x18d   :  { %v811_v62 = vsel %vm114_vm0, %v3082_v50, 0.0  ;;  %v714_v63 = vpop.f32.mrb[6].mxu0  ;;  %v850_v2 = vadd.f32 %v849_v53, %v848_v49  ;;  %v859_v6 = vmul.f32 %v3082_v50, %v3082_v50  ;;  %v853_v1 = vsel %vm114_vm0, %v847_v52, 0.0 }
 0x18e   :  { %v3104_v7 = vadd.f32 %v714_v63, %v3016_v32  ;;  %v716_v13 = vpop.f32.mrb[7].mxu0  ;;  %v806_v14 = vadd.f32 %v805_v51, %v804_v57  ;;  %v812_v15 = vadd.f32 %v811_v62, %v810_v55  ;;  %v813_v29 = vsel %vm114_vm0, %v3078_v40, 0.0 }
 0x18f   :  { %v3107_v19 = vadd.f32 %v716_v13, %v3016_v32  ;;  %v785_v25 = vpop.f32.mrb[6].mxu1  ;;  %v852_v26 = vadd.f32 %v851_v58, %v850_v2  ;;  %v815_v51 = vsel %vm114_vm0, %v3092_v56, 0.0  ;;  %v861_v57 = vmul.f32 %v3092_v56, %v3092_v56 }
 0x190   :  { %v820_v30 = vsel %vm114_vm0, %v3104_v7, 0.0  ;;  %v872_v31 = vmul.f32 %v3104_v7, %v3104_v7  ;;  %v3117_v33 = vadd.f32 %v785_v25, %v3016_v32  ;;  %v787_v34 = vpop.f32.mrb[7].mxu1  ;;  %807 = vadd.xlane.f32.xlu0 %v806_v14  ;;  %v814_v37 = vadd.f32 %v813_v29, %v812_v15 }
 0x191   :  { %v821_v38 = vsel %vm114_vm0, %v3107_v19, 0.0  ;;  %v873_v41 = vmul.f32 %v3107_v19, %v3107_v19  ;;  %v3124_v42 = vadd.f32 %v787_v34, %v3016_v32  ;;  %v854_v43 = vadd.f32 %v853_v1, %v852_v26 }
 0x192   :  { %v874_v49 = vmul.f32 %v3117_v33, %v3117_v33  ;;  %v822_v52 = vadd.f32 %v821_v38, %v820_v30  ;;  %v823_v53 = vsel %vm114_vm0, %v3117_v33, 0.0  ;;  %v816_v55 = vadd.f32 %v815_v51, %v814_v37 }
 0x193   :  { %855 = vadd.xlane.f32.xlu1 %v854_v43  ;;  %v862_v58 = vsel %vm114_vm0, %v858_v59, 0.0  ;;  %v863_v32 = vsel %vm114_vm0, %v859_v6, 0.0  ;;  %v825_v63 = vsel %vm114_vm0, %v3124_v42, 0.0  ;;  %v865_v13 = vsel %vm114_vm0, %v860_v61, 0.0 }
 0x194   :  { %v824_v62 = vadd.f32 %v823_v53, %v822_v52  ;;  %v864_v2 = vadd.f32 %v863_v32, %v862_v58  ;;  %v875_v14 = vmul.f32 %v3124_v42, %v3124_v42  ;;  %v876_v15 = vsel %vm114_vm0, %v872_v31, 0.0 }
 0x195   :  { %v877_v25 = vsel %vm114_vm0, %v873_v41, 0.0  ;;  %v879_v26 = vsel %vm114_vm0, %v874_v49, 0.0  ;;  %v867_v6 = vsel %vm114_vm0, %v861_v57, 0.0  ;;  %v2773_v38 = vmov 1  }
 0x196   :  { %v826_v1 = vadd.f32 %v825_v63, %v824_v62  ;;  %v866_v59 = vadd.f32 %v865_v13, %v864_v2  ;;  %v878_v29 = vadd.f32 %v877_v25, %v876_v15  ;;  %v881_v61 = vsel %vm114_vm0, %v875_v14, 0.0  ;;  %2667 = vset.pattern.permute.xlu0 %v2773_v38 }
 0x197   :  { %817 = vadd.xlane.f32.xlu1 %v816_v55 }
 0x198   :  { %827 = vadd.xlane.f32.xlu0 %v826_v1  ;;  %v880_v30 = vadd.f32 %v879_v26, %v878_v29  ;;  %v868_v34 = vadd.f32 %v867_v6, %v866_v59  ;;  %v2774_v1 = vmov 2  }
 0x199   :  { %2668 = vset.pattern.permute.xlu1 %v2774_v1 }
 0x19a   :  { %v882_v37 = vadd.f32 %v881_v61, %v880_v30 }
 0x19b   :  { %869 = vadd.xlane.f32.xlu1 %v868_v34 }
 0x19c   :  { %883 = vadd.xlane.f32.xlu0 %v882_v37 }
 0x209   :  { %v798_v31 = vpop.xlane.xlu1 %797 }
 0x20b   :  { %v842_v41 = vpop.xlane.xlu0 %841 }
 0x21d   :  { %v808_v43 = vpop.xlane.xlu0 %807 }
 0x21e   :  { %v809_v51 = vadd.f32 %v808_v43, %v798_v31 }
 0x220   :  { %v856_v49 = vpop.xlane.xlu1 %855 }
 0x221   :  { %v857_v58 = vadd.f32 %v856_v49, %v842_v41 }
 0x224   :  { %v818_v52 = vpop.xlane.xlu1 %817 }
 0x225   :  { %v819_v53 = vadd.f32 %v818_v52, %v809_v51  ;;  %v828_v55 = vpop.xlane.xlu0 %827 }
 0x227   :  { %v829_v32 = vadd.f32 %v828_v55, %v819_v53 }
 0x228   :  { %v870_v57 = vpop.xlane.xlu1 %869 }
 0x229   :  { %v887_v62 = vmul.f32 0.00048828125, %v829_v32  ;;  %v871_v63 = vadd.f32 %v870_v57, %v857_v58  ;;  %v884_v2 = vpop.xlane.xlu0 %883 }
 0x22b   :  { %v885_v13 = vadd.f32 %v884_v2, %v871_v63  ;;  %v889_v14 = vmul.f32 %v887_v62, %v887_v62 }
 0x22d   :  { %v888_v15 = vmul.f32 0.00048828125, %v885_v13 }
 0x22f   :  { %v890_v25 = vsub.f32 %v888_v15, %v889_v14 }
 0x231   :  { %v891_v26 = vadd.f32 1e-05, %v890_v25 }
 0x233   :  { %2681 = vrsqrt.f32 %v891_v26 }
 0x23d   :  { %v2682_v59 = vpop.eup %2681 }
 0x23e   :  { %v893_v29 = vmul.f32 %v2682_v59, %v2847_v5 }
 0x240   :  { %902 = vperm.xlu0 %2667, %v893_v29   ;;  %v894_v6 = vmul.f32 %v893_v29, %v887_v62 }
 0x242   :  { %896 = vrot.lane.b32.xlu1 %v894_v6, %s2775_s10 }
 0x244   :  { %1141 = vrot.lane.b32.xlu0 %v2847_v5, %s2776_s11 }
 0x2b4   :  { %v897_v30 = vpop.permute.xlu1 %896 }
 0x2b5   :  { %v899_v34 = vsub.f32 %v2847_v5, %v897_v30 }
 0x2b7   :  { %911 = vperm.xlu1 %2668, %v899_v34  }
 0x2bf   :  { %v3150_v61 = vpop.permute.xlu0 %902 }
 0x2c0   :  { %v970_v37 = vmul.f32 %v3150_v61, %v3104_v7  ;;  %v950_v38 = vmul.f32 %v3150_v61, %v3075_v39  ;;  %v971_v31 = vmul.f32 %v3150_v61, %v3107_v19  ;;  %v951_v41 = vmul.f32 %v3150_v61, %v3082_v50 }
 0x2c1   :  { %v973_v7 = vmul.f32 %v3150_v61, %v3124_v42  ;;  %v930_v42 = vmul.f32 %v3150_v61, %v3051_v20  ;;  %v972_v14 = vmul.f32 %v3150_v61, %v3117_v33  ;;  %v931_v20 = vmul.f32 %v3150_v61, %v3057_v27 }
 0x2c2   :  { %v907_v33 = vmul.f32 %v3150_v61, %v3022_v45  ;;  %v933_v30 = vmul.f32 %v3150_v61, %v3060_v21 }
 0x336   :  { %v3160_v43 = vpop.permute.xlu1 %911 }
 0x337   :  { %v974_v49 = vadd.f32 %v970_v37, %v3160_v43  ;;  %v954_v51 = vadd.f32 %v950_v38, %v3160_v43  ;;  %v975_v52 = vadd.f32 %v971_v31, %v3160_v43  ;;  %v955_v53 = vadd.f32 %v951_v41, %v3160_v43 }
 0x338   :  { %v977_v55 = vadd.f32 %v973_v7, %v3160_v43  ;;  %v934_v13 = vadd.f32 %v930_v42, %v3160_v43  ;;  %v976_v26 = vadd.f32 %v972_v14, %v3160_v43  ;;  %v935_v1 = vadd.f32 %v931_v20, %v3160_v43 }
 0x339   :  { %vm978_vm13 = vcmp.ge.f32.partialorder %v974_v49, 0.0  ;;  %v982_v39 = vmul.f32 0.25, %v974_v49  ;;  %vm958_vm14 = vcmp.ge.f32.partialorder %v954_v51, 0.0  ;;  %v962_v19 = vmul.f32 0.25, %v954_v51 }
 0x33a   :  { %v983_v32 = vmul.f32 0.25, %v975_v52  ;;  %v963_v57 = vmul.f32 0.25, %v955_v53  ;;  %vm979_vm15 = vcmp.ge.f32.partialorder %v975_v52, 0.0  ;;  %vm959_vm1 = vcmp.ge.f32.partialorder %v955_v53, 0.0 }
 0x33b   :  { %v3169_v50 = vsel %vm978_vm13, %v974_v49, %v982_v39  ;;  %v3171_v58 = vsel %vm958_vm14, %v954_v51, %v962_v19  ;;  %v985_v2 = vmul.f32 0.25, %v977_v55  ;;  %vm981_vm2 = vcmp.ge.f32.partialorder %v977_v55, 0.0 }
 0x33c   :  { %990 = vrot.lane.b32.xlu1 %v3169_v50, %s2775_s10  ;;  %1040 = vrot.lane.b32.xlu0 %v3171_v58, %s2777_s12  ;;  %v3179_v62 = vsel %vm979_vm15, %v975_v52, %v983_v32  ;;  %v3181_v63 = vsel %vm959_vm1, %v955_v53, %v963_v57  ;;  %v942_v25 = vmul.f32 0.25, %v934_v13  ;;  %vm938_vm5 = vcmp.ge.f32.partialorder %v934_v13, 0.0 }
 0x33d   :  { %v3192_v15 = vsel %vm981_vm2, %v977_v55, %v985_v2  ;;  %v984_v27 = vmul.f32 0.25, %v976_v26  ;;  %v943_v29 = vmul.f32 0.25, %v935_v1  ;;  %v916_v6 = vadd.f32 %v3160_v43, %v907_v33 }
 0x33e   :  { %v3202_v59 = vsel %vm938_vm5, %v934_v13, %v942_v25  ;;  %vm980_vm7 = vcmp.ge.f32.partialorder %v976_v26, 0.0  ;;  %vm939_vm8 = vcmp.ge.f32.partialorder %v935_v1, 0.0  ;;  %v937_v38 = vadd.f32 %v933_v30, %v3160_v43 }
 0x33f   :  { %v3211_v34 = vsel %vm980_vm7, %v976_v26, %v984_v27  ;;  %v3213_v45 = vsel %vm939_vm8, %v935_v1, %v943_v29  ;;  %v924_v37 = vmul.f32 0.25, %v916_v6  ;;  %vm920_vm10 = vcmp.ge.f32.partialorder %v916_v6, 0.0 }
 0x340   :  { %992 = vrot.lane.b32.xlu1 %v3179_v62, %s2775_s10  ;;  %1042 = vrot.lane.b32.xlu0 %v3181_v63, %s2777_s12  ;;  %v953_v31 = vmul.f32 %v3150_v61, %v3092_v56  ;;  %v945_v21 = vmul.f32 0.25, %v937_v38  ;;  %vm941_vm11 = vcmp.ge.f32.partialorder %v937_v38, 0.0  ;;  %v932_v51 = vmul.f32 %v3150_v61, %v3054_v24 }
 0x341   :  { %v3222_v41 = vsel %vm920_vm10, %v916_v6, %v924_v37  ;;  %v952_v24 = vmul.f32 %v3150_v61, %v3078_v40  ;;  %v906_v32 = vmul.f32 %v3150_v61, %v3025_v47  ;;  %v905_v40 = vmul.f32 %v3150_v61, %v3019_v44 }
 0x342   :  { %v957_v49 = vadd.f32 %v953_v31, %v3160_v43  ;;  %v3231_v52 = vsel %vm941_vm11, %v937_v38, %v945_v21  ;;  %v936_v56 = vadd.f32 %v932_v51, %v3160_v43  ;;  %v908_v25 = vmul.f32 %v3150_v61, %v3028_v48  ;;  %v3323_v48 = vpop.permute.xlu0 %1141 }
 0x343   :  { %v956_v55 = vadd.f32 %v952_v24, %v3160_v43  ;;  %v915_v42 = vadd.f32 %v3160_v43, %v906_v32  ;;  %v914_v14 = vadd.f32 %v3160_v43, %v905_v40  ;;  %vm89_vm5 = vcmp.ge.s32.totalorder %v49_v11, 1 }
 0x344   :  { %996 = vrot.lane.b32.xlu1 %v3192_v15, %s2775_s10  ;;  %1023 = vrot.lane.b32.xlu0 %v3169_v50, %s2777_s12  ;;  %v965_v53 = vmul.f32 0.25, %v957_v49  ;;  %vm961_vm12 = vcmp.ge.f32.partialorder %v957_v49, 0.0  ;;  %v944_v39 = vmul.f32 0.25, %v936_v56  ;;  %vm940_vm13 = vcmp.ge.f32.partialorder %v936_v56, 0.0 }
 0x345   :  { %v964_v57 = vmul.f32 0.25, %v956_v55  ;;  %vm960_vm14 = vcmp.ge.f32.partialorder %v956_v55, 0.0  ;;  %v923_v13 = vmul.f32 0.25, %v915_v42  ;;  %vm919_vm15 = vcmp.ge.f32.partialorder %v915_v42, 0.0 }
 0x346   :  { %v3238_v7 = vsel %vm961_vm12, %v957_v49, %v965_v53  ;;  %v3246_v19 = vsel %vm940_vm13, %v936_v56, %v944_v39  ;;  %v922_v20 = vmul.f32 0.25, %v914_v14  ;;  %vm918_vm1 = vcmp.ge.f32.partialorder %v914_v14, 0.0 }
 0x347   :  { %v3262_v2 = vsel %vm960_vm14, %v956_v55, %v964_v57  ;;  %v3269_v47 = vsel %vm919_vm15, %v915_v42, %v923_v13  ;;  %v917_v26 = vadd.f32 %v3160_v43, %v908_v25  ;;  %vm998_vm7 = vcmp.lt.s32.totalorder %v2882_v8, 1 }
 0x348   :  { %1025 = vrot.lane.b32.xlu0 %v3179_v62, %s2777_s12  ;;  %1007 = vrot.lane.b32.xlu1 %v3202_v59, %s2775_s10  ;;  %4154 = vst [vmem:[#allocation16_spill] sm:$0xff] %v3269_v47  ;;  %v3274_v44 = vsel %vm918_vm1, %v914_v14, %v922_v20  ;;  %v3331_v27 = vsel %vm89_vm5, 1.0, %v4125_v0  ;;  %vm88_vm8 = vcmp.ge.s32.totalorder %v48_v10, 1  ;;  %v1082_v30 = vrot.slane %v3181_v63, 4 }
 0x349   :  { %v925_v1 = vmul.f32 0.25, %v917_v26  ;;  %vm921_vm2 = vcmp.ge.f32.partialorder %v917_v26, 0.0  ;;  %v2782_v38 = vmov 6   ;;  %v4124_v11 = vrot.slane %v3213_v45, 4 }
 0x34a   :  { %2669 = vset.pattern.permute.xlu1 %v2782_v38  ;;  %v1382_v31 = vrot.slane %v3269_v47, 4  ;;  %v3345_v21 = vsel %vm88_vm8, 1.0, %v4125_v0  ;;  %v3351_v53 = vsel %vm114_vm0, %v3179_v62, %v1082_v30  ;;  %v1081_v39 = vrot.slane %v3171_v58, 4 }
 0x34b   :  { %v3290_v33 = vsel %vm921_vm2, %v917_v26, %v925_v1  ;;  %4155 = vst [vmem:[#allocation17_spill] sm:$0xff] %v3351_v53  ;;  %v4123_v32 = vrot.slane %v3202_v59, 4  ;;  %vm1031_vm10 = vcmp.lt.s32.totalorder %v2882_v8, 16  ;;  %vm90_vm11 = vcmp.ge.s32.totalorder %v50_v22, 1 }
 0x34c   :  { %1027 = vrot.lane.b32.xlu0 %v3211_v34, %s2777_s12  ;;  %1009 = vrot.lane.b32.xlu1 %v3213_v45, %s2775_s10  ;;  %v3366_v57 = vsel %vm114_vm0, %v3213_v45, %v1382_v31  ;;  %v3382_v25 = vsel %vm114_vm0, %v3169_v50, %v1081_v39  ;;  %vm91_vm12 = vcmp.ge.s32.totalorder %v51_v23, 1  ;;  %v3410_v16 = vsel %vm90_vm11, 1.0, %v4125_v0 }
 0x34d   :  { %4158 = vst [vmem:[#allocation20_spill] sm:$0xff] %v3382_v25  ;;  %v3413_v23 = vsel %vm91_vm12, 1.0, %v4125_v0  ;;  %v1084_v39 = vrot.slane %v3238_v7, 4  ;;  %v4162_v4 = vrot.slane %v3246_v19, 4  ;;  %vm1064_vm15 = vcmp.lt.s32.totalorder %v2882_v8, 17 }
 0x34e   :  { %v4167_v54 = vrot.slane %v3213_v45, 4  ;;  %vm1143_vm1 = vcmask 293888   ;;  %vm1340_vm2 = vcmp.lt.s32.totalorder %v2882_v8, 15 }
 0x350   :  { %1320 = vrot.lane.b32.xlu0 %v3222_v41, %s2765_s4  ;;  %994 = vrot.lane.b32.xlu1 %v3211_v34, %s2775_s10 }
 0x354   :  { %1302 = vrot.lane.b32.xlu0 %v3181_v63, %s2765_s4  ;;  %1013 = vrot.lane.b32.xlu1 %v3231_v52, %s2775_s10 }
 0x358   :  { %1056 = vrot.lane.b32.xlu0 %v3169_v50, %s2778_s13  ;;  %1046 = vrot.lane.b32.xlu1 %v3238_v7, %s2777_s12 }
 0x35c   :  { %1300 = vrot.lane.b32.xlu0 %v3171_v58, %s2765_s4  ;;  %1011 = vrot.lane.b32.xlu1 %v3246_v19, %s2775_s10 }
 0x360   :  { %1062 = vrot.lane.b32.xlu0 %v3192_v15, %s2778_s13  ;;  %1029 = vrot.lane.b32.xlu1 %v3192_v15, %s2777_s12 }
 0x364   :  { %1060 = vrot.lane.b32.xlu0 %v3211_v34, %s2778_s13  ;;  %1044 = vrot.lane.b32.xlu1 %v3262_v2, %s2777_s12 }
 0x368   :  { %1334 = vrot.lane.b32.xlu0 %v3181_v63, %s2779_s14  ;;  %1318 = vrot.lane.b32.xlu1 %v3269_v47, %s2765_s4 }
 0x36c   :  { %1585 = vrot.lane.b32.xlu0 %v3269_v47, %s2767_s5  ;;  %1316 = vrot.lane.b32.xlu1 %v3274_v44, %s2765_s4 }
 0x370   :  { %1569 = vrot.lane.b32.xlu0 %v3213_v45, %s2767_s5  ;;  %1304 = vrot.lane.b32.xlu1 %v3262_v2, %s2765_s4 }
 0x374   :  { %1601 = vrot.lane.b32.xlu0 %v3213_v45, %s2780_s15  ;;  %1058 = vrot.lane.b32.xlu1 %v3179_v62, %s2778_s13 }
 0x378   :  { %1583 = vrot.lane.b32.xlu0 %v3274_v44, %s2767_s5  ;;  %1322 = vrot.lane.b32.xlu1 %v3290_v33, %s2765_s4 }
 0x37c   :  { %1599 = vrot.lane.b32.xlu0 %v3202_v59, %s2780_s15  ;;  %1306 = vrot.lane.b32.xlu1 %v3238_v7, %s2765_s4 }
 0x380   :  { %1573 = vrot.lane.b32.xlu0 %v3231_v52, %s2767_s5  ;;  %1332 = vrot.lane.b32.xlu1 %v3171_v58, %s2779_s14 }
 0x384   :  { %1808 = vrot.lane.b32.xlu0 %v3269_v47, %s2768_s6  ;;  %1338 = vrot.lane.b32.xlu1 %v3238_v7, %s2779_s14 }
 0x388   :  { %1806 = vrot.lane.b32.xlu0 %v3274_v44, %s2768_s6  ;;  %1336 = vrot.lane.b32.xlu1 %v3262_v2, %s2779_s14 }
 0x38c   :  { %1587 = vrot.lane.b32.xlu1 %v3222_v41, %s2767_s5  ;;  %2169 = vrot.lane.b32.xlu0 %v2847_v5, %s2781_s16 }
 0x390   :  { %1571 = vrot.lane.b32.xlu1 %v3246_v19, %s2767_s5 }
 0x394   :  { %1603 = vrot.lane.b32.xlu1 %v3246_v19, %s2780_s15 }
 0x398   :  { %1589 = vrot.lane.b32.xlu1 %v3290_v33, %s2767_s5 }
 0x39c   :  { %1567 = vrot.lane.b32.xlu1 %v3202_v59, %s2767_s5 }
 0x3a0   :  { %1605 = vrot.lane.b32.xlu1 %v3231_v52, %s2780_s15 }
 0x3a4   :  { %1810 = vrot.lane.b32.xlu1 %v3222_v41, %s2768_s6 }
 0x3a8   :  { %1812 = vrot.lane.b32.xlu1 %v3290_v33, %s2768_s6 }
 0x3ac   :  { %2166 = vperm.xlu1 %2669, %v2847_v5  }
 0x3ae   :  { %v991_v61 = vpop.permute.xlu1 %990  ;;  %v3325_v43 = vpop.permute.xlu0 %1040 }
 0x3b2   :  { %v993_v29 = vpop.permute.xlu1 %992  ;;  %v3333_v6 = vpop.permute.xlu0 %1042 }
 0x3b3   :  { %v1001_v37 = vsel %vm998_vm7, %v991_v61, %v993_v29  ;;  %v3396_v30 = vsel %vm1031_vm10, %v3325_v43, %v3333_v6 }
 0x3b4   :  { %v1004_v9 = vmul.f32 %v3331_v27, %v1001_v37 }
 0x3b6   :  { %v1637_v49 = vrot.slane %v1004_v9, 4  ;;  %v997_v10 = vpop.permute.xlu1 %996  ;;  %v3347_v51 = vpop.permute.xlu0 %1023  ;;  %v1130_v56 = vsel %vm114_vm0, %v1004_v9, %v4124_v11  ;;  %v1118_v9 = vrot.slane %v3396_v30, 4 }
 0x3b7   :  { %v1002_v5 = vsel %vm998_vm7, %v997_v10, %v991_v61  ;;  %v2574_v24 = vpack.c.bf16 %v1130_v56, %v3351_v53 }
 0x3b8   :  { %v3361_v55 = vmul.f32 %v3345_v21, %v1002_v5  ;;  %v3370_v42 = vsel %vm114_vm0, %v3181_v63, %v1637_v49  ;;  %v1083_v5 = vrot.slane %v3262_v2, 4 }
 0x3b9   :  { %4157 = vst [vmem:[#allocation19_spill] sm:$0xff] %v3370_v42  ;;  %2575 = vmatprep.subr.bf16.mxu0 %v2574_v24 }
 0x3ba   :  { %4156 = vst [vmem:[#allocation18_spill] sm:$0xff] %v3361_v55  ;;  %v1129_v13 = vsel %vm114_vm0, %v3361_v55, %v4123_v32  ;;  %v3378_v14 = vpop.permute.xlu0 %1025  ;;  %v1008_v20 = vpop.permute.xlu1 %1007 }
 0x3bb   :  { %v2576_v26 = vpack.c.bf16 %v1129_v13, %v3382_v25  ;;  %v3407_v22 = vsel %vm1031_vm10, %v3347_v51, %v3378_v14 }
 0x3bc   :  { %v1138_v40 = vsel %vm114_vm0, %v3407_v22, %v1118_v9 }
 0x3bd   :  { %2577 = vmatpush1.bf16.msra.mxu0 %v2576_v26 }
 0x3be   :  { %v3386_v1 = vpop.permute.xlu0 %1027  ;;  %v1010_v61 = vpop.permute.xlu1 %1009 }
 0x3bf   :  { %v1017_v37 = vsel %vm998_vm7, %v1008_v20, %v1010_v61 }
 0x3c0   :  { %v3401_v38 = vmul.f32 %v3331_v27, %v1017_v37  ;;  %v4130_v37 = vrot.slane %v3231_v52, 4 }
 0x3c2   :  { %4159 = vst [vmem:[#allocation21_spill] sm:$0xff] %v3401_v38  ;;  %v1106_v31 = vrot.slane %v3401_v38, 4  ;;  %v3417_v49 = vpop.permute.xlu0 %1320  ;;  %v995_v56 = vpop.permute.xlu1 %994 }
 0x3c3   :  { %v999_v13 = vsel %vm998_vm7, %v995_v56, %v997_v10  ;;  %v1000_v26 = vsel %vm998_vm7, %v993_v29, %v995_v56  ;;  %v44_v10 = vand.u32 255, %v2882_v8 }
 0x3c4   :  { %v3430_v32 = vmul.f32 %v3410_v16, %v1000_v26  ;;  %v3433_v11 = vmul.f32 %v3413_v23, %v999_v13  ;;  %v1134_v0 = vsel %vm114_vm0, %v3269_v47, %v1106_v31  ;;  %v3446_v26 = vsel %vm114_vm0, %v3192_v15, %v1084_v39 }
 0x3c5   :  { %v2578_v24 = vpack.c.bf16 %v1138_v40, %v1134_v0  ;;  %v3454_v0 = vsel %vm114_vm0, %v3211_v34, %v1083_v5  ;;  %vm64_vm13 = vcmp.ge.s32.totalorder %v44_v10, 16  ;;  %v4163_v47 = vmov 0.0  }
 0x3c6   :  { %4160 = vst [vmem:[#allocation22_spill] sm:$0xff] %v3430_v32  ;;  %4161 = vst [vmem:[#allocation23_spill] sm:$0xff] %v3433_v11  ;;  %v1131_v29 = vsel %vm114_vm0, %v3430_v32, %v4162_v4  ;;  %v3442_v56 = vpop.permute.xlu0 %1302  ;;  %v1014_v9 = vpop.permute.xlu1 %1013  ;;  %v1132_v31 = vsel %vm114_vm0, %v3433_v11, %v4130_v37  ;;  %v3463_v37 = vsel %vm64_vm13, 1.0, %v4163_v47 }
 0x3c7   :  { %2579 = vmatprep.subr.bf16.mxu0 %v2578_v24  ;;  %v2582_v40 = vpack.c.bf16 %v1132_v31, %v3446_v26  ;;  %v2584_v4 = vpack.c.bf16 %v1131_v29, %v3454_v0  ;;  %v1018_v3 = vsel %vm998_vm7, %v1014_v9, %v1008_v20 }
 0x3c8   :  { %v3469_v24 = vmul.f32 %v3345_v21, %v1018_v3 }
 0x3c9   :  { %2583 = vmatprep.subr.bf16.mxu1 %v2582_v40  ;;  %v46_v40 = vand.u32 255, %v2890_v12 }
 0x3ca   :  { %v3458_v13 = vpop.permute.xlu0 %1056  ;;  %2585 = vmatpush1.bf16.msra.mxu1 %v2584_v4  ;;  %v1047_v39 = vpop.permute.xlu1 %1046  ;;  %4164 = vst [vmem:[#allocation24_spill] sm:$0xff] %v3469_v24  ;;  %v1105_v60 = vrot.slane %v3469_v24, 4 }
 0x3cb   :  { %v1051_v5 = vsel %vm1031_vm10, %v1047_v39, %v3325_v43  ;;  %vm66_vm14 = vcmp.ge.s32.totalorder %v46_v40, 16 }
 0x3cc   :  { %v3477_v20 = vmul.f32 %v3463_v37, %v1051_v5 }
 0x3ce   :  { %v3471_v29 = vpop.permute.xlu0 %1300  ;;  %v1012_v31 = vpop.permute.xlu1 %1011 }
 0x3cf   :  { %v1015_v10 = vsel %vm998_vm7, %v1012_v31, %v1014_v9  ;;  %v1016_v4 = vsel %vm998_vm7, %v1010_v61, %v1012_v31  ;;  %v1117_v9 = vrot.slane %v3477_v20, 4  ;;  %v3496_v61 = vsel %vm66_vm14, 1.0, %v4163_v47 }
 0x3d0   :  { %v3483_v43 = vmul.f32 %v3413_v23, %v1015_v10  ;;  %v3490_v5 = vmul.f32 %v3410_v16, %v1016_v4  ;;  %v1033_v4 = vsel %vm1031_vm10, %v3378_v14, %v3386_v1 }
 0x3d2   :  { %4165 = vst [vmem:[#allocation25_spill] sm:$0xff] %v3483_v43  ;;  %v1063_v3 = vpop.permute.xlu0 %1062  ;;  %v1030_v38 = vpop.permute.xlu1 %1029  ;;  %4166 = vst [vmem:[#allocation26_spill] sm:$0xff] %v3490_v5  ;;  %v1108_v31 = vrot.slane %v3483_v43, 4 }
 0x3d3   :  { %v1035_v12 = vsel %vm1031_vm10, %v1030_v38, %v3347_v51  ;;  %v1133_v51 = vsel %vm114_vm0, %v3274_v44, %v1105_v60  ;;  %v3523_v14 = vsel %vm1031_vm10, %v3386_v1, %v1030_v38 }
 0x3d4   :  { %v3493_v46 = vmul.f32 %v3463_v37, %v1035_v12 }
 0x3d6   :  { %v1137_v40 = vsel %vm114_vm0, %v3493_v46, %v1117_v9  ;;  %v1045_v10 = vpop.permute.xlu1 %1044  ;;  %v1107_v9 = vrot.slane %v3490_v5, 4  ;;  %v1061_v32 = vpop.permute.xlu0 %1060 }
 0x3d7   :  { %v3509_v12 = vsel %vm1031_vm10, %v1045_v10, %v1047_v39  ;;  %v1049_v43 = vsel %vm1031_vm10, %v3333_v6, %v1045_v10  ;;  %v2580_v24 = vpack.c.bf16 %v1137_v40, %v1133_v51  ;;  %v3526_v39 = vmul.f32 %v3496_v61, %v1033_v4 }
 0x3d8   :  { %v3516_v42 = vmul.f32 %v3496_v61, %v1049_v43  ;;  %v1120_v60 = vrot.slane %v3509_v12, 4  ;;  %v1136_v43 = vsel %vm114_vm0, %v3290_v33, %v1108_v31  ;;  %v1065_v51 = vsel %vm1064_vm15, %v1061_v32, %v1063_v3 }
 0x3d9   :  { %2581 = vmatpush1.bf16.msra.mxu0 %v2580_v24  ;;  %v1135_v4 = vsel %vm114_vm0, %v3222_v41, %v1107_v9 }
 0x3da   :  { %v1119_v6 = vrot.slane %v3516_v42, 4  ;;  %v1319_v40 = vpop.permute.xlu1 %1318  ;;  %v1140_v10 = vsel %vm114_vm0, %v3523_v14, %v1120_v60  ;;  %v1076_v60 = vmul.f32 %v3413_v23, %v1065_v51 }
 0x3db   :  { %v1325_v1 = vsel %vm275_vm3, %v1319_v40, %v3417_v49  ;;  %v2586_v38 = vpack.c.bf16 %v1140_v10, %v1136_v43 }
 0x3dc   :  { %v1329_v24 = vmul.f32 %v2905_v18, %v1325_v1  ;;  %v1139_v5 = vsel %vm114_vm0, %v3526_v39, %v1119_v6  ;;  %v4169_v6 = vrot.slane %v3202_v59, 4 }
 0x3dd   :  { %2587 = vmatprep.subr.bf16.mxu1 %v2586_v38  ;;  %v2588_v31 = vpack.c.bf16 %v1139_v5, %v1135_v4  ;;  %v3555_v5 = vpop.permute.xlu0 %1334 }
 0x3de   :  { %v1317_v11 = vpop.permute.xlu1 %1316  ;;  %v3547_v55 = vsel %vm114_vm0, %v1329_v24, %v4167_v54 }
 0x3df   :  { %4168 = vst [vmem:[#allocation27_spill] sm:$0xff] %v3547_v55  ;;  %v1326_v43 = vsel %vm275_vm3, %v1317_v11, %v1319_v40  ;;  %2589 = vmatpush1.bf16.msra.mxu1 %v2588_v31  ;;  %v1310_v40 = vsel %vm275_vm3, %v3471_v29, %v3442_v56  ;;  %v1071_v31 = vmul.f32 %v3410_v16, %v3496_v61  ;;  %v4171_v55 = vrot.slane %v3169_v50, 4 }
 0x3e0   :  { %v1328_v10 = vmul.f32 %v2902_v17, %v1326_v43  ;;  %2539 = vmatprep.subr.msk.mxu1 %vm114_vm0, %v1076_v60  ;;  %v1069_v60 = vmul.f32 %v3345_v21, %v3463_v37  ;;  %v1370_v43 = vrot.slane %v1329_v24, 4  ;;  %v3580_v9 = vmul.f32 %v2902_v17, %v1310_v40 }
 0x3e1   :  { %v3586_v1 = vpop.permute.xlu0 %1585 }
 0x3e2   :  { %v3560_v45 = vsel %vm114_vm0, %v1328_v10, %v4169_v6  ;;  %v1305_v54 = vpop.permute.xlu1 %1304  ;;  %v1369_v38 = vrot.slane %v1328_v10, 4  ;;  %v1358_v6 = vrot.slane %v3179_v62, 4 }
 0x3e3   :  { %4170 = vst [vmem:[#allocation28_spill] sm:$0xff] %v3560_v45  ;;  %v1309_v51 = vsel %vm275_vm3, %v3442_v56, %v1305_v54  ;;  %v1068_v56 = vsel %vm1064_vm15, %v1063_v3, %v3458_v13 }
 0x3e4   :  { %v3572_v4 = vmul.f32 %v2905_v18, %v1309_v51  ;;  %v1405_v51 = vsel %vm114_vm0, %v3171_v58, %v1369_v38  ;;  %v1073_v53 = vmul.f32 %v1069_v60, %v1068_v56  ;;  %v4173_v56 = vrot.slane %v3231_v52, 4 }
 0x3e6   :  { %v1059_v10 = vpop.permute.xlu1 %1058  ;;  %v1402_v40 = vsel %vm114_vm0, %v3572_v4, %v1358_v6 }
 0x3e7   :  { %v1066_v25 = vsel %vm1064_vm15, %v1059_v10, %v1061_v32  ;;  %v1067_v24 = vsel %vm1064_vm15, %v3458_v13, %v1059_v10  ;;  %v1406_v32 = vsel %vm114_vm0, %v3181_v63, %v1370_v43  ;;  %v1401_v13 = vsel %vm114_vm0, %v3580_v9, %v4171_v55 }
 0x3e8   :  { %v1074_v45 = vmul.f32 %v3331_v27, %v1067_v24  ;;  %v1075_v3 = vmul.f32 %v1071_v31, %v1066_v25  ;;  %v2590_v24 = vpack.c.bf16 %v1406_v32, %v1402_v40  ;;  %v2592_v63 = vpack.c.bf16 %v1405_v51, %v1401_v13 }
 0x3e9   :  { %v4148_v40 = vrot.slane %v3211_v34, 4  ;;  %v1345_v13 = vmul.f32 %v2902_v17, %v3463_v37 }
 0x3ea   :  { %2540 = vmatpush1.msk.msra.mxu1 %vm114_vm0, %v1075_v3  ;;  %v1323_v10 = vpop.permute.xlu1 %1322  ;;  %2536 = vmatprep.subr.msk.mxu0 %vm114_vm0, %v1074_v45  ;;  %v3620_v45 = vpop.permute.xlu0 %1569 }
 0x3eb   :  { %v1324_v25 = vsel %vm275_vm3, %v3417_v49, %v1323_v10  ;;  %v1327_v38 = vsel %vm275_vm3, %v1323_v10, %v1317_v11  ;;  %2537 = vmatpush1.msk.msra.mxu0 %vm114_vm0, %v1073_v53  ;;  %2541 = vmatmul.mubr.msk.f32.vlgmr.msra.gmra.mrb[8].mxu1 %vm1143_vm1, %v3323_v48  ;;  %v4172_v53 = vrot.slane %v3246_v19, 4 }
 0x3ec   :  { %v1330_v55 = vmul.f32 %v2945_v35, %v1324_v25  ;;  %v1331_v31 = vmul.f32 %v2948_v36, %v1327_v38  ;;  %2538 = vmatmul.mubr.msk.f32.vlgmr.msra.gmra.mrb[8].mxu0 %vm1143_vm1, %v3323_v48  ;;  %2591 = vmatprep.subr.bf16.mxu0 %v2590_v24  ;;  %v4147_v25 = vrot.slane %v3192_v15, 4 }
 0x3ed   :  { %2593 = vmatpush1.bf16.msra.mxu0 %v2592_v63  ;;  %1489 = vmatprep.mubr.f32.mxu0 %v4163_v47 }
 0x3ee   :  { %v1371_v11 = vrot.slane %v1330_v55, 4  ;;  %v1372_v49 = vrot.slane %v1331_v31, 4  ;;  %v3626_v60 = vsel %vm114_vm0, %v1330_v55, %v4172_v53  ;;  %v1307_v43 = vpop.permute.xlu1 %1306  ;;  %1560 = vmatprep.mubr.f32.mxu1 %v4163_v47  ;;  %v3632_v51 = vsel %vm114_vm0, %v1331_v31, %v4173_v56  ;;  %v3664_v53 = vpop.permute.xlu0 %1601 }
 0x3ef   :  { %v1308_v3 = vsel %vm275_vm3, %v1305_v54, %v1307_v43  ;;  %v1311_v32 = vsel %vm275_vm3, %v1307_v43, %v3471_v29  ;;  %vm1607_vm3 = vcmp.lt.s32.totalorder %v2882_v8, 113 }
 0x3f0   :  { %v3643_v10 = vmul.f32 %v2945_v35, %v1308_v3  ;;  %v3646_v24 = vmul.f32 %v2948_v36, %v1311_v32  ;;  %v1408_v55 = vsel %vm114_vm0, %v3238_v7, %v1372_v49  ;;  %v1407_v31 = vsel %vm114_vm0, %v3262_v2, %v1371_v11 }
 0x3f1   :  { %v1394_v32 = vrot.slane %v3407_v22, 4 }
 0x3f2   :  { %v1403_v29 = vsel %vm114_vm0, %v3643_v10, %v4148_v40  ;;  %v1333_v38 = vpop.permute.xlu1 %1332  ;;  %v1404_v63 = vsel %vm114_vm0, %v3646_v24, %v4147_v25  ;;  %v1381_v25 = vrot.slane %v3274_v44, 4 }
 0x3f3   :  { %v1343_v43 = vsel %vm1340_vm2, %v1333_v38, %v3555_v5  ;;  %v2598_v56 = vpack.c.bf16 %v1408_v55, %v1404_v63  ;;  %v2600_v3 = vpack.c.bf16 %v1407_v31, %v1403_v29  ;;  %v1393_v29 = vrot.slane %v3493_v46, 4  ;;  %v1584_v55 = vpop.permute.xlu0 %1583 }
 0x3f4   :  { %v1350_v54 = vmul.f32 %v2905_v18, %v1343_v43  ;;  %v1347_v18 = vmul.f32 %v2945_v35, %v3496_v61  ;;  %v1384_v43 = vrot.slane %v3290_v33, 4 }
 0x3f5   :  { %2599 = vmatprep.subr.bf16.mxu1 %v2598_v56  ;;  %v1396_v56 = vrot.slane %v3523_v14, 4 }
 0x3f6   :  { %2601 = vmatpush1.bf16.msra.mxu1 %v2600_v3  ;;  %v1339_v49 = vpop.permute.xlu1 %1338  ;;  %v1414_v11 = vsel %vm114_vm0, %v1350_v54, %v1394_v32  ;;  %v3684_v54 = vsel %vm114_vm0, %v3202_v59, %v1381_v25 }
 0x3f7   :  { %v1344_v40 = vsel %vm1340_vm2, %v1339_v49, %v1333_v38  ;;  %v2594_v63 = vpack.c.bf16 %v1414_v11, %v3366_v57  ;;  %v1383_v38 = vrot.slane %v3222_v41, 4  ;;  %v1600_v14 = vpop.permute.xlu0 %1599 }
 0x3f8   :  { %v1349_v22 = vmul.f32 %v1345_v13, %v1344_v40  ;;  %v1395_v13 = vrot.slane %v3526_v39, 4 }
 0x3f9   :  { %2595 = vmatprep.subr.bf16.mxu0 %v2594_v63  ;;  %v3707_v39 = vsel %vm114_vm0, %v3246_v19, %v1383_v38  ;;  %v1593_v38 = vsel %vm447_vm6, %v1584_v55, %v3586_v1 }
 0x3fa   :  { %v1413_v37 = vsel %vm114_vm0, %v1349_v22, %v1393_v29  ;;  %v1337_v31 = vpop.permute.xlu1 %1336 }
 0x3fb   :  { %v1341_v46 = vsel %vm1340_vm2, %v1337_v31, %v1339_v49  ;;  %v1342_v61 = vsel %vm1340_vm2, %v3555_v5, %v1337_v31  ;;  %v2596_v40 = vpack.c.bf16 %v1413_v37, %v3684_v54  ;;  %v3702_v49 = vsel %vm114_vm0, %v3231_v52, %v1384_v43  ;;  %v1574_v29 = vpop.permute.xlu0 %1573 }
 0x3fc   :  { %v1351_v3 = vmul.f32 %v1347_v18, %v1342_v61  ;;  %v1352_v59 = vmul.f32 %v2948_v36, %v1341_v46 }
 0x3fd   :  { %2597 = vmatpush1.bf16.msra.mxu0 %v2596_v40  ;;  %v4174_v40 = vld [vmem:[#allocation18_spill] sm:$0xff] }
 0x3fe   :  { %v1415_v25 = vsel %vm114_vm0, %v1351_v3, %v1395_v13  ;;  %v1588_v32 = vpop.permute.xlu1 %1587  ;;  %2542 = vmatprep.subr.msk.mxu0 %vm114_vm0, %v3396_v30  ;;  %v1416_v5 = vsel %vm114_vm0, %v1352_v59, %v1396_v56  ;;  %v1636_v13 = vrot.slane %v4174_v40, 4  ;;  %v1624_v3 = vrot.slane %v1593_v38, 4 }
 0x3ff   :  { %v2602_v36 = vpack.c.bf16 %v1416_v5, %v3702_v49  ;;  %v2604_v11 = vpack.c.bf16 %v1415_v25, %v3707_v39  ;;  %v1592_v63 = vsel %vm447_vm6, %v3586_v1, %v1588_v32  ;;  %v1809_v46 = vpop.permute.xlu0 %1808  ;;  %v4175_v25 = vld [vmem:[#allocation14_spill] sm:$0xff] }
 0x400   :  { %v3725_v30 = vmul.f32 %v2925_v28, %v1592_v63  ;;  %v4177_v63 = vld [vmem:[#allocation23_spill] sm:$0xff] }
 0x401   :  { %2543 = vmatpush1.msk.msra.mxu0 %vm114_vm0, %v3477_v20  ;;  %2603 = vmatprep.subr.bf16.mxu1 %v2602_v36  ;;  %v1613_v20 = vmul.f32 %v3331_v27, %v2925_v28 }
 0x402   :  { %2605 = vmatpush1.bf16.msra.mxu1 %v2604_v11  ;;  %v1572_v52 = vpop.permute.xlu1 %1571  ;;  %2544 = vmatmul.mubr.msk.f32.vlgmr.msra.gmra.mrb[10].mxu0 %vm1143_vm1, %v3323_v48  ;;  %v1625_v37 = vrot.slane %v3725_v30, 4  ;;  %v1652_v11 = vsel %vm114_vm0, %v3171_v58, %v1636_v13  ;;  %v4180_v13 = vld [vmem:[#allocation22_spill] sm:$0xff] }
 0x403   :  { %v1576_v19 = vsel %vm447_vm6, %v3620_v45, %v1572_v52  ;;  %2545 = vmatprep.subr.msk.mxu1 %vm114_vm0, %v3509_v12  ;;  %1728 = vmatprep.mubr.f32.mxu0 %v4163_v47 }
 0x404   :  { %v3731_v22 = vmul.f32 %v2925_v28, %v1576_v19  ;;  %v1610_v28 = vsel %vm1607_vm3, %v1600_v14, %v3664_v53  ;;  %v1807_v19 = vpop.permute.xlu0 %1806 }
 0x405   :  { %v1616_v56 = vmul.f32 %v3345_v21, %v1610_v28  ;;  %v1615_v21 = vmul.f32 %v3413_v23, %v4175_v25  ;;  %v2612_v28 = vpack.c.bf16 %v3684_v54, %v1652_v11  ;;  %v1816_v58 = vsel %vm614_vm9, %v1807_v19, %v1809_v46  ;;  %v4184_v11 = vld [vmem:[#allocation21_spill] sm:$0xff] }
 0x406   :  { %2546 = vmatpush1.msk.msra.mxu1 %vm114_vm0, %v3516_v42  ;;  %v1604_v18 = vpop.permute.xlu1 %1603  ;;  %v1645_v42 = vsel %vm114_vm0, %v3731_v22, %v1625_v37 }
 0x407   :  { %v1609_v12 = vsel %vm1607_vm3, %v3664_v53, %v1604_v18  ;;  %2547 = vmatmul.mubr.msk.f32.vlgmr.msra.gmra.mrb[10].mxu1 %vm1143_vm1, %v3323_v48 }
 0x408   :  { %v1617_v27 = vmul.f32 %v1613_v20, %v1609_v12  ;;  %1799 = vmatprep.mubr.f32.mxu1 %v4163_v47 }
 0x40a   :  { %v1590_v31 = vpop.permute.xlu1 %1589  ;;  %v1649_v43 = vsel %vm114_vm0, %v1617_v27, %v1358_v6 }
 0x40b   :  { %v2606_v61 = vpack.c.bf16 %v1649_v43, %v1645_v42  ;;  %v1594_v53 = vsel %vm447_vm6, %v1590_v31, %v1584_v55  ;;  %v3759_v62 = vsel %vm447_vm6, %v1588_v32, %v1590_v31  ;;  %v4176_v55 = vrot.slane %v3169_v50, 4 }
 0x40c   :  { %v3769_v5 = vmul.f32 %v4175_v25, %v1594_v53  ;;  %v1626_v12 = vrot.slane %v3759_v62, 4 }
 0x40d   :  { %2607 = vmatprep.subr.bf16.mxu0 %v2606_v61  ;;  %v1648_v36 = vsel %vm114_vm0, %v1616_v56, %v4176_v55  ;;  %v4178_v61 = vld [vmem:[#allocation19_spill] sm:$0xff]  ;;  %v1827_v55 = vrot.slane %v3731_v22, 4 }
 0x40e   :  { %v1568_v59 = vpop.permute.xlu1 %1567  ;;  %v1627_v31 = vrot.slane %v3769_v5, 4  ;;  %v4179_v40 = vpack.c.bf16 %v3366_v57, %v4178_v61  ;;  %v4182_v57 = vrot.slane %v3192_v15, 4 }
 0x40f   :  { %v1577_v1 = vsel %vm447_vm6, %v1568_v59, %v3620_v45  ;;  %v1578_v6 = vsel %vm447_vm6, %v1574_v29, %v1568_v59  ;;  %v1639_v45 = vrot.slane %v4177_v63, 4 }
 0x410   :  { %v1644_v32 = vsel %vm114_vm0, %v1577_v1, %v1624_v3  ;;  %v1582_v23 = vmul.f32 %v4175_v25, %v1578_v6  ;;  %v1826_v56 = vrot.slane %v1577_v1, 4  ;;  %v4181_v3 = vrot.slane %v3211_v34, 4 }
 0x411   :  { %v2608_v20 = vpack.c.bf16 %v1648_v36, %v1644_v32  ;;  %v1655_v54 = vsel %vm114_vm0, %v3238_v7, %v1639_v45  ;;  %v1838_v1 = vrot.slane %v3580_v9, 4  ;;  %v1839_v34 = vrot.slane %v3572_v4, 4  ;;  %v4183_v36 = vld [vmem:[#allocation13_spill] sm:$0xff] }
 0x412   :  { %v1606_v37 = vpop.permute.xlu1 %1605  ;;  %v1647_v6 = vsel %vm114_vm0, %v1582_v23, %v1627_v31 }
 0x413   :  { %v1608_v27 = vsel %vm1607_vm3, %v1604_v18, %v1606_v37  ;;  %v1611_v50 = vsel %vm1607_vm3, %v1606_v37, %v1600_v14  ;;  %2609 = vmatpush1.bf16.msra.mxu0 %v2608_v20  ;;  %v1638_v18 = vrot.slane %v4180_v13, 4  ;;  %v1575_v14 = vsel %vm447_vm6, %v1572_v52, %v1574_v29  ;;  %v4193_v13 = vld [vmem:[#allocation20_spill] sm:$0xff] }
 0x414   :  { %v1618_v42 = vmul.f32 %v3410_v16, %v1608_v27  ;;  %v1619_v43 = vmul.f32 %v1615_v21, %v1611_v50  ;;  %2611 = vmatprep.subr.bf16.mxu0 %v4179_v40  ;;  %v1646_v53 = vsel %vm114_vm0, %v1575_v14, %v1626_v12  ;;  %v1818_v21 = vmul.f32 %v2902_v17, %v1816_v58  ;;  %v4185_v12 = vld [vmem:[#allocation24_spill] sm:$0xff]  ;;  %v4189_v58 = vld [vmem:[#allocation17_spill] sm:$0xff] }
 0x415   :  { %v2618_v17 = vpack.c.bf16 %v3702_v49, %v1655_v54  ;;  %v1850_v63 = vsel %vm114_vm0, %v1593_v38, %v1838_v1  ;;  %v1851_v22 = vsel %vm114_vm0, %v3725_v30, %v1839_v34  ;;  %v4186_v38 = vld [vmem:[#allocation15_spill] sm:$0xff]  ;;  %v1829_v50 = vrot.slane %v1582_v23, 4  ;;  %v4192_v40 = vld [vmem:[#allocation28_spill] sm:$0xff] }
 0x416   :  { %v1650_v16 = vsel %vm114_vm0, %v1618_v42, %v4181_v3  ;;  %v1811_v59 = vpop.permute.xlu1 %1810  ;;  %v1651_v25 = vsel %vm114_vm0, %v1619_v43, %v4182_v57  ;;  %v1846_v15 = vsel %vm114_vm0, %v1818_v21, %v1826_v56  ;;  %v1828_v8 = vrot.slane %v1575_v14, 4  ;;  %v2687_v54 = vld [vmem:[#allocation2] sm:$0xff] }
 0x417   :  { %v1815_v52 = vsel %vm614_vm9, %v1809_v46, %v1811_v59  ;;  %2613 = vmatpush1.bf16.msra.mxu0 %v2612_v28  ;;  %v2614_v7 = vpack.c.bf16 %v1651_v25, %v1647_v6  ;;  %v2616_v29 = vpack.c.bf16 %v1650_v16, %v1646_v53  ;;  %v1654_v46 = vsel %vm114_vm0, %v3262_v2, %v1638_v18  ;;  %v4187_v28 = vld [vmem:[#allocation25_spill] sm:$0xff]  ;;  %v2170_v53 = vpop.permute.xlu0 %2169 }
 0x418   :  { %v1819_v32 = vmul.f32 %v1815_v52, %v4183_v36  ;;  %2548 = vmatprep.subr.msk.mxu0 %vm114_vm0, %v4184_v11  ;;  %v2620_v30 = vpack.c.bf16 %v3707_v39, %v1654_v46  ;;  %v2624_v27 = vpack.c.bf16 %v1850_v63, %v1846_v15  ;;  %v1840_v39 = vrot.slane %v3643_v10, 4  ;;  %v4195_v10 = vld [vmem:[#allocation16_spill] sm:$0xff] }
 0x419   :  { %2615 = vmatprep.subr.bf16.mxu1 %v2614_v7  ;;  %v4194_v18 = vpack.c.bf16 %v4192_v40, %v4193_v13  ;;  %v4198_v3 = vpack.c.bf16 %v3626_v60, %v3454_v0  ;;  %v2783_v0 = vmov 3  }
 0x41a   :  { %2617 = vmatpush1.bf16.msra.mxu1 %v2616_v29  ;;  %v1813_v9 = vpop.permute.xlu1 %1812  ;;  %v1847_v4 = vsel %vm114_vm0, %v1819_v32, %v1827_v55  ;;  %v1852_v61 = vsel %vm114_vm0, %v3759_v62, %v1840_v39  ;;  %v4196_v62 = vpack.c.bf16 %v3632_v51, %v3446_v26  ;;  %v2688_v26 = vld [vmem:[#allocation2 + $0x8] sm:$0xff]  ;;  %2670 = vset.pattern.permute.xlu0 %v2783_v0 }
 0x41b   :  { %v1814_v45 = vsel %vm614_vm9, %v1811_v59, %v1813_v9  ;;  %v1817_v20 = vsel %vm614_vm9, %v1813_v9, %v1807_v19  ;;  %2549 = vmatpush1.msk.msra.mxu0 %vm114_vm0, %v4185_v12  ;;  %2619 = vmatprep.subr.bf16.mxu1 %v2618_v17  ;;  %v2622_v2 = vpack.c.bf16 %v1851_v22, %v1847_v4  ;;  %v1841_v19 = vrot.slane %v3646_v24, 4  ;;  %v4191_v24 = vld [vmem:[#allocation26_spill] sm:$0xff] }
 0x41c   :  { %v1820_v49 = vmul.f32 %v2945_v35, %v1814_v45  ;;  %v1821_v37 = vmul.f32 %v1817_v20, %v4186_v38  ;;  %2550 = vmatmul.mubr.msk.f32.vlgmr.msra.gmra.mrb[12].mxu0 %vm1143_vm1, %v3323_v48  ;;  %v4188_v35 = vld [vmem:[#allocation27_spill] sm:$0xff] }
 0x41d   :  { %2623 = vmatprep.subr.bf16.mxu0 %v2622_v2  ;;  %1930 = vmatprep.mubr.f32.mxu0 %v4163_v47  ;;  %v4190_v31 = vpack.c.bf16 %v4188_v35, %v4189_v58  ;;  %v1853_v43 = vsel %vm114_vm0, %v3769_v5, %v1841_v19  ;;  %v4197_v5 = vld [vmem:[#allocation11_spill] sm:$0xff] }
 0x41e   :  { %2621 = vmatpush1.bf16.msra.mxu1 %v2620_v30  ;;  %2625 = vmatpush1.bf16.msra.mxu0 %v2624_v27  ;;  %v1849_v42 = vsel %vm114_vm0, %v1821_v37, %v1829_v50  ;;  %v1848_v23 = vsel %vm114_vm0, %v1820_v49, %v1828_v8 }
 0x41f   :  { %2551 = vmatprep.subr.msk.mxu1 %vm114_vm0, %v4187_v28  ;;  %2627 = vmatprep.subr.bf16.mxu0 %v4190_v31  ;;  %v2630_v14 = vpack.c.bf16 %v1853_v43, %v1849_v42  ;;  %v2632_v56 = vpack.c.bf16 %v1852_v61, %v1848_v23  ;;  %v3933_v31 = vld [vmem:[#allocation5] sm:$0xf] }
 0x420   :  { %v2324_v42 = vmul.f32 1536.0, %v3933_v31 }
 0x422   :  { %2552 = vmatpush1.msk.msra.mxu1 %vm114_vm0, %v4191_v24  ;;  %2629 = vmatpush1.bf16.msra.mxu0 %v4194_v18  ;;  %v2339_v39 = vmul.f32 %v3933_v31, %v2324_v42 }
 0x423   :  { %2553 = vmatmul.mubr.msk.f32.vlgmr.msra.gmra.mrb[12].mxu1 %vm1143_vm1, %v3323_v48  ;;  %2554 = vmatprep.subr.msk.mxu0 %vm114_vm0, %v4195_v10 }
 0x424   :  { %2631 = vmatprep.subr.bf16.mxu1 %v2630_v14  ;;  %2001 = vmatprep.mubr.f32.mxu1 %v4163_v47 }
 0x425   :  { %2633 = vmatpush1.bf16.msra.mxu1 %v2632_v56 }
 0x426   :  { %2635 = vmatprep.subr.bf16.mxu1 %v4196_v62  ;;  %2555 = vmatpush1.msk.msra.mxu0 %vm114_vm0, %v3274_v44  ;;  %v4199_v44 = vld [vmem:[#allocation12_spill] sm:$0xff] }
 0x427   :  { %2556 = vmatmul.mubr.msk.f32.vlgmr.msra.gmra.mrb[14].mxu0 %vm1143_vm1, %v3323_v48  ;;  %2560 = vmatprep.subr.msk.mxu0 %vm114_vm0, %v4197_v5 }
 0x428   :  { %2561 = vmatpush1.msk.msra.mxu0 %vm114_vm0, %v2687_v54  ;;  %2237 = vmatprep.mubr.f32.mxu0 %v4163_v47 }
 0x429   :  { %2637 = vmatpush1.bf16.msra.mxu1 %v4198_v3 }
 0x42a   :  { %2557 = vmatprep.subr.msk.mxu1 %vm114_vm0, %v3290_v33 }
 0x42b   :  { %2562 = vmatmul.mubr.msk.f32.vlgmr.msra.gmra.mrb[16].mxu0 %vm111_vm4, %v2170_v53  ;;  %v2167_v29 = vpop.permute.xlu1 %2166 }
 0x42d   :  { %2558 = vmatpush1.msk.msra.mxu1 %vm114_vm0, %v3222_v41 }
 0x42e   :  { %2559 = vmatmul.mubr.msk.f32.vlgmr.msra.gmra.mrb[14].mxu1 %vm1143_vm1, %v3323_v48  ;;  %2563 = vmatprep.subr.msk.mxu1 %vm114_vm0, %v4199_v44 }
 0x42f   :  { %2564 = vmatpush1.msk.msra.mxu1 %vm114_vm0, %v2688_v26  ;;  %2308 = vmatprep.mubr.f32.mxu1 %v4163_v47 }
 0x432   :  { %2565 = vmatmul.mubr.msk.f32.vlgmr.msra.gmra.mrb[16].mxu1 %vm111_vm4, %v2170_v53 }
 0x4be   :  { %v1295_v33 = vpop.f32.mrb[8].mxu1 }
 0x4bf   :  { %v1224_v60 = vpop.f32.mrb[8].mxu0  ;;  %v1297_v51 = vpop.f32.mrb[9].mxu1 }
 0x4c0   :  { %v1226_v16 = vpop.f32.mrb[9].mxu0 }
 0x4d5   :  { %v1491_v41 = vpop.f32.mrb[10].mxu0 }
 0x4d6   :  { %v3883_v59 = vpop.f32.mrb[11].mxu0 }
 0x4da   :  { %v3885_v48 = vpop.f32.mrb[10].mxu1 }
 0x4db   :  { %v3887_v6 = vpop.f32.mrb[11].mxu1 }
 0x4ef   :  { %v3889_v57 = vpop.f32.mrb[12].mxu0 }
 0x4f0   :  { %v3891_v25 = vpop.f32.mrb[13].mxu0 }
 0x4f6   :  { %v3893_v47 = vpop.f32.mrb[12].mxu1 }
 0x4f7   :  { %v3895_v21 = vpop.f32.mrb[13].mxu1 }
 0x4fa   :  { %v3897_v52 = vpop.f32.mrb[14].mxu0 }
 0x4fb   :  { %v3899_v7 = vpop.f32.mrb[15].mxu0 }
 0x4fe   :  { %v2239_v1 = vpop.f32.mrb[16].mxu0 }
 0x4ff   :  { %v3901_v34 = vadd.f32 %v2239_v1, %v2167_v29  ;;  %v2241_v55 = vpop.f32.mrb[17].mxu0 }
 0x500   :  { %v3903_v36 = vadd.f32 %v2241_v55, %v2167_v29 }
 0x501   :  { %v3905_v32 = vpop.f32.mrb[14].mxu1  ;;  %v2326_v11 = vmul.f32 %v3901_v34, %v3901_v34  ;;  %v2315_v63 = vsel %vm114_vm0, %v3901_v34, 0.0 }
 0x502   :  { %v3909_v15 = vpop.f32.mrb[15].mxu1  ;;  %v2316_v17 = vsel %vm114_vm0, %v3903_v36, 0.0  ;;  %v2327_v46 = vmul.f32 %v3903_v36, %v3903_v36 }
 0x503   :  { %v2330_v9 = vsel %vm114_vm0, %v2326_v11, 0.0  ;;  %v2317_v45 = vadd.f32 %v2316_v17, %v2315_v63 }
 0x504   :  { %v2331_v4 = vsel %vm114_vm0, %v2327_v46, 0.0 }
 0x505   :  { %v2310_v22 = vpop.f32.mrb[16].mxu1  ;;  %v2332_v49 = vadd.f32 %v2331_v4, %v2330_v9 }
 0x506   :  { %v3919_v20 = vadd.f32 %v2310_v22, %v2167_v29  ;;  %v2312_v12 = vpop.f32.mrb[17].mxu1 }
 0x507   :  { %v3921_v2 = vadd.f32 %v2312_v12, %v2167_v29 }
 0x508   :  { %v2328_v38 = vmul.f32 %v3919_v20, %v3919_v20  ;;  %v2318_v37 = vsel %vm114_vm0, %v3919_v20, 0.0 }
 0x509   :  { %v2319_v30 = vadd.f32 %v2318_v37, %v2317_v45  ;;  %v2320_v27 = vsel %vm114_vm0, %v3921_v2, 0.0  ;;  %v2329_v50 = vmul.f32 %v3921_v2, %v3921_v2 }
 0x50a   :  { %v2333_v8 = vsel %vm114_vm0, %v2328_v38, 0.0 }
 0x50b   :  { %v2321_v19 = vadd.f32 %v2320_v27, %v2319_v30  ;;  %v2334_v28 = vadd.f32 %v2333_v8, %v2332_v49  ;;  %v2335_v35 = vsel %vm114_vm0, %v2329_v50, 0.0 }
 0x50d   :  { %2322 = vadd.xlane.f32.xlu0 %v2321_v19  ;;  %v2336_v58 = vadd.f32 %v2335_v35, %v2334_v28 }
 0x50f   :  { %2337 = vadd.xlane.f32.xlu1 %v2336_v58 }
 0x523   :  { %2009 = vperm.xlu0 %2670, %v3933_v31  }
 0x59a   :  { %v2323_v23 = vpop.xlane.xlu0 %2322 }
 0x59b   :  { %v2325_v43 = vadd.f32 %v2324_v42, %v2323_v23 }
 0x59c   :  { %v2338_v61 = vpop.xlane.xlu1 %2337 }
 0x59d   :  { %v3938_v24 = vmul.f32 0.00048828125, %v2325_v43  ;;  %v2340_v40 = vadd.f32 %v2339_v39, %v2338_v61 }
 0x59f   :  { %v2343_v13 = vmul.f32 %v3938_v24, %v3938_v24  ;;  %v2342_v18 = vmul.f32 0.00048828125, %v2340_v40 }
 0x5a1   :  { %v2344_v14 = vsub.f32 %v2342_v18, %v2343_v13 }
 0x5a2   :  { %v2010_v10 = vpop.permute.xlu0 %2009 }
 0x5a3   :  { %v2345_v56 = vadd.f32 1e-05, %v2344_v14  ;;  %v3942_v62 = vadd.f32 %v2010_v10, %v1224_v60  ;;  %v3944_v5 = vadd.f32 %v2010_v10, %v1226_v16  ;;  %v3946_v54 = vadd.f32 %v2010_v10, %v1295_v33 }
 0x5a4   :  { %v3948_v53 = vadd.f32 %v2010_v10, %v1297_v51  ;;  %v3954_v26 = vadd.f32 %v2010_v10, %v1491_v41  ;;  %v3959_v60 = vadd.f32 %v2010_v10, %v3883_v59  ;;  %v3966_v1 = vadd.f32 %v2010_v10, %v3885_v48 }
 0x5a5   :  { %2683 = vrsqrt.f32 %v2345_v56  ;;  %v2062_v3 = vmul.f32 %v3942_v62, %v3942_v62  ;;  %v2063_v44 = vmul.f32 %v3944_v5, %v3944_v5  ;;  %v2064_v0 = vmul.f32 %v3946_v54, %v3946_v54 }
 0x5a6   :  { %v2065_v33 = vmul.f32 %v3948_v53, %v3948_v53  ;;  %v2066_v41 = vmul.f32 %v3954_v26, %v3954_v26  ;;  %v3972_v59 = vadd.f32 %v2010_v10, %v3887_v6  ;;  %v2067_v46 = vmul.f32 %v3959_v60, %v3959_v60 }
 0x5a7   :  { %v2078_v51 = vsel %vm114_vm0, %v2062_v3, 0.0  ;;  %v2079_v16 = vsel %vm114_vm0, %v2063_v44, 0.0  ;;  %v2081_v55 = vsel %vm114_vm0, %v2064_v0, 0.0  ;;  %v3979_v48 = vadd.f32 %v2010_v10, %v3889_v57 }
 0x5a8   :  { %v2080_v29 = vadd.f32 %v2079_v16, %v2078_v51  ;;  %v2083_v63 = vsel %vm114_vm0, %v2065_v33, 0.0  ;;  %v2068_v4 = vmul.f32 %v3966_v1, %v3966_v1  ;;  %v2085_v22 = vsel %vm114_vm0, %v2066_v41, 0.0 }
 0x5a9   :  { %v3985_v6 = vadd.f32 %v2010_v10, %v3891_v25  ;;  %v2069_v12 = vmul.f32 %v3972_v59, %v3972_v59  ;;  %v2087_v49 = vsel %vm114_vm0, %v2067_v46, 0.0  ;;  %v3991_v37 = vadd.f32 %v2010_v10, %v3893_v47 }
 0x5aa   :  { %v2082_v11 = vadd.f32 %v2081_v55, %v2080_v29  ;;  %v2070_v57 = vmul.f32 %v3979_v48, %v3979_v48  ;;  %v2089_v30 = vsel %vm114_vm0, %v2068_v4, 0.0  ;;  %v3997_v50 = vadd.f32 %v2010_v10, %v3895_v21 }
 0x5ab   :  { %v2071_v25 = vmul.f32 %v3985_v6, %v3985_v6  ;;  %v2091_v8 = vsel %vm114_vm0, %v2069_v12, 0.0  ;;  %v4003_v28 = vadd.f32 %v2010_v10, %v3897_v52  ;;  %v2072_v47 = vmul.f32 %v3991_v37, %v3991_v37 }
 0x5ac   :  { %v2084_v9 = vadd.f32 %v2083_v63, %v2082_v11  ;;  %v2093_v35 = vsel %vm114_vm0, %v2070_v57, 0.0  ;;  %v4009_v42 = vadd.f32 %v2010_v10, %v3899_v7  ;;  %v2073_v21 = vmul.f32 %v3997_v50, %v3997_v50 }
 0x5ad   :  { %v2095_v39 = vsel %vm114_vm0, %v2071_v25, 0.0  ;;  %v4015_v43 = vadd.f32 %v2010_v10, %v3905_v32  ;;  %v2074_v52 = vmul.f32 %v4003_v28, %v4003_v28  ;;  %v2097_v61 = vsel %vm114_vm0, %v2072_v47, 0.0 }
 0x5ae   :  { %v2086_v45 = vadd.f32 %v2085_v22, %v2084_v9  ;;  %v4021_v13 = vadd.f32 %v2010_v10, %v3909_v15  ;;  %v2075_v7 = vmul.f32 %v4009_v42, %v4009_v42  ;;  %v2099_v18 = vsel %vm114_vm0, %v2073_v21, 0.0 }
 0x5af   :  { %v2684_v17 = vpop.eup %2683  ;;  %v2076_v56 = vmul.f32 %v4015_v43, %v4015_v43  ;;  %v2101_v32 = vsel %vm114_vm0, %v2074_v52, 0.0  ;;  %v2028_v29 = vsel %vm114_vm0, %v3942_v62, 0.0  ;;  %v2029_v41 = vsel %vm114_vm0, %v3944_v5, 0.0 }
 0x5b0   :  { %2348 = vrot.lane.b32.xlu1 %v2684_v17, %s2775_s10  ;;  %v2088_v38 = vadd.f32 %v2087_v49, %v2086_v45  ;;  %v2077_v44 = vmul.f32 %v4021_v13, %v4021_v13  ;;  %v2103_v0 = vsel %vm114_vm0, %v2075_v7, 0.0  ;;  %v2030_v55 = vadd.f32 %v2029_v41, %v2028_v29 }
 0x5b1   :  { %v2105_v15 = vsel %vm114_vm0, %v2076_v56, 0.0  ;;  %v2031_v11 = vsel %vm114_vm0, %v3946_v54, 0.0  ;;  %v2033_v46 = vsel %vm114_vm0, %v3948_v53, 0.0  ;;  %v2035_v9 = vsel %vm114_vm0, %v3954_v26, 0.0 }
 0x5b2   :  { %v2090_v27 = vadd.f32 %v2089_v30, %v2088_v38  ;;  %v2107_v51 = vsel %vm114_vm0, %v2077_v44, 0.0  ;;  %v2032_v17 = vadd.f32 %v2031_v11, %v2030_v55  ;;  %v2037_v22 = vsel %vm114_vm0, %v3959_v60, 0.0 }
 0x5b3   :  { %v2039_v49 = vsel %vm114_vm0, %v3966_v1, 0.0  ;;  %v2041_v30 = vsel %vm114_vm0, %v3972_v59, 0.0  ;;  %v2043_v25 = vsel %vm114_vm0, %v3979_v48, 0.0  ;;  %v2049_v21 = vsel %vm114_vm0, %v3997_v50, 0.0 }
 0x5b4   :  { %v2092_v19 = vadd.f32 %v2091_v8, %v2090_v27  ;;  %v2034_v63 = vadd.f32 %v2033_v46, %v2032_v17  ;;  %v2055_v7 = vsel %vm114_vm0, %v4015_v43, 0.0  ;;  %v2786_v41 = vmov 5  }
 0x5b5   :  { %2673 = vset.pattern.permute.xlu0 %v2786_v41 }
 0x5b6   :  { %v2094_v58 = vadd.f32 %v2093_v35, %v2092_v19  ;;  %v2036_v4 = vadd.f32 %v2035_v9, %v2034_v63  ;;  %v2045_v19 = vsel %vm114_vm0, %v3985_v6, 0.0  ;;  %v2047_v35 = vsel %vm114_vm0, %v3991_v37, 0.0 }
 0x5b7   :  { %v2787_v63 = vmov 7   ;;  %v2788_v9 = vmov 8  }
 0x5b8   :  { %v2096_v23 = vadd.f32 %v2095_v39, %v2094_v58  ;;  %v2038_v45 = vadd.f32 %v2037_v22, %v2036_v4 }
 0x5ba   :  { %v2098_v40 = vadd.f32 %v2097_v61, %v2096_v23  ;;  %v2040_v57 = vadd.f32 %v2039_v49, %v2038_v45  ;;  %v2051_v23 = vsel %vm114_vm0, %v4003_v28, 0.0  ;;  %v2053_v61 = vsel %vm114_vm0, %v4009_v42, 0.0 }
 0x5bc   :  { %v2100_v14 = vadd.f32 %v2099_v18, %v2098_v40  ;;  %v2042_v27 = vadd.f32 %v2041_v30, %v2040_v57 }
 0x5be   :  { %v2102_v3 = vadd.f32 %v2101_v32, %v2100_v14  ;;  %v2044_v8 = vadd.f32 %v2043_v25, %v2042_v27  ;;  %v2057_v14 = vsel %vm114_vm0, %v4021_v13, 0.0  ;;  %v2784_v32 = vmov 4  }
 0x5bf   :  { %2671 = vset.pattern.permute.xlu1 %v2784_v32 }
 0x5c0   :  { %v2104_v33 = vadd.f32 %v2103_v0, %v2102_v3  ;;  %v2046_v47 = vadd.f32 %v2045_v19, %v2044_v8 }
 0x5c2   :  { %v2106_v10 = vadd.f32 %v2105_v15, %v2104_v33  ;;  %v2048_v58 = vadd.f32 %v2047_v35, %v2046_v47 }
 0x5c4   :  { %v2108_v16 = vadd.f32 %v2107_v51, %v2106_v10  ;;  %v2050_v39 = vadd.f32 %v2049_v21, %v2048_v58 }
 0x5c6   :  { %2109 = vadd.xlane.f32.xlu0 %v2108_v16  ;;  %v2052_v52 = vadd.f32 %v2051_v23, %v2050_v39 }
 0x5c8   :  { %v2054_v40 = vadd.f32 %v2053_v61, %v2052_v52 }
 0x5ca   :  { %v2056_v18 = vadd.f32 %v2055_v7, %v2054_v40 }
 0x5cc   :  { %v2058_v56 = vadd.f32 %v2057_v14, %v2056_v18 }
 0x622   :  { %v2349_v12 = vpop.permute.xlu1 %2348 }
 0x623   :  { %v2351_v38 = vmul.f32 %v3933_v31, %v2349_v12 }
 0x625   :  { %2353 = vrot.lane.b32.xlu1 %v2351_v38, %s2765_s4 }
 0x649   :  { %2059 = vadd.xlane.f32.xlu1 %v2058_v56 }
 0x653   :  { %v2110_v0 = vpop.xlane.xlu0 %2109 }
 0x654   :  { %v2111_v10 = vmul.f32 0.00048828125, %v2110_v0 }
 0x697   :  { %v2354_v3 = vpop.permute.xlu1 %2353 }
 0x698   :  { %v2356_v44 = vmul.f32 %v2354_v3, %v3938_v24 }
 0x69a   :  { %2358 = vrot.lane.b32.xlu1 %v2356_v44, %s2785_s17 }
 0x69e   :  { %2379 = vrot.lane.b32.xlu1 %v3933_v31, %s2775_s10 }
 0x6d6   :  { %v2060_v33 = vpop.xlane.xlu1 %2059 }
 0x6d7   :  { %v2061_v15 = vmul.f32 0.00048828125, %v2060_v33 }
 0x6d9   :  { %v2112_v51 = vmul.f32 %v2061_v15, %v2061_v15 }
 0x6db   :  { %v2113_v16 = vsub.f32 %v2111_v10, %v2112_v51 }
 0x6dd   :  { %v2114_v29 = vadd.f32 1e-05, %v2113_v16 }
 0x6df   :  { %2685 = vrsqrt.f32 %v2114_v29 }
 0x6e9   :  { %v2686_v55 = vpop.eup %2685 }
 0x6ea   :  { %v2116_v11 = vmul.f32 %v3933_v31, %v2686_v55 }
 0x6ec   :  { %v2117_v17 = vmul.f32 %v2116_v11, %v2061_v15 }
 0x6ee   :  { %2119 = vrot.lane.b32.xlu0 %v2117_v17, %s2775_s10 }
 0x70c   :  { %v2359_v24 = vpop.permute.xlu1 %2358 }
 0x70d   :  { %v2361_v46 = vsub.f32 %v3933_v31, %v2359_v24 }
 0x70f   :  { %2383 = vrot.lane.b32.xlu1 %v2361_v46, %s2765_s4 }
 0x710   :  { %v2380_v45 = vpop.permute.xlu1 %2379 }
 0x711   :  { %v2382_v12 = vmul.f32 %v2380_v45, %v2351_v38 }
 0x713   :  { %2125 = vperm.xlu1 %2671, %v2116_v11  }
 0x717   :  { %2672 = vset.pattern.permute.xlu1 %v2787_v63 }
 0x718   :  { %2363 = vperm.xlu1 %2672, %v2351_v38  }
 0x71c   :  { %2674 = vset.pattern.permute.xlu1 %v2788_v9 }
 0x71d   :  { %2372 = vperm.xlu1 %2674, %v2361_v46  }
 0x721   :  { %2675 = vset.pattern.permute.xlu1 %v2787_v63 }
 0x760   :  { %v2120_v4 = vpop.permute.xlu0 %2119 }
 0x761   :  { %v2122_v22 = vsub.f32 %v3933_v31, %v2120_v4 }
 0x763   :  { %2146 = vperm.xlu0 %2673, %v2122_v22  }
 0x767   :  { %2676 = vset.pattern.permute.xlu0 %v2787_v63 }
 0x781   :  { %v2384_v49 = vpop.permute.xlu1 %2383 }
 0x782   :  { %v2386_v57 = vadd.f32 %v2384_v49, %v2382_v12 }
 0x784   :  { %2393 = vperm.xlu1 %2675, %v2386_v57  }
 0x792   :  { %v2126_v30 = vpop.permute.xlu1 %2125 }
 0x793   :  { %v2128_v25 = vmul.f32 %v2126_v30, %v3942_v62  ;;  %v2129_v8 = vmul.f32 %v2126_v30, %v3944_v5  ;;  %v2130_v19 = vmul.f32 %v2126_v30, %v3946_v54  ;;  %v2131_v47 = vmul.f32 %v2126_v30, %v3948_v53 }
 0x794   :  { %v2132_v10 = vmul.f32 %v2126_v30, %v3954_v26  ;;  %v2133_v51 = vmul.f32 %v2126_v30, %v3959_v60  ;;  %v2134_v16 = vmul.f32 %v2126_v30, %v3966_v1  ;;  %v2135_v29 = vmul.f32 %v2126_v30, %v3972_v59 }
 0x795   :  { %v2136_v41 = vmul.f32 %v2126_v30, %v3979_v48  ;;  %v2137_v55 = vmul.f32 %v2126_v30, %v3985_v6  ;;  %v2138_v11 = vmul.f32 %v2126_v30, %v3991_v37  ;;  %v2139_v17 = vmul.f32 %v2126_v30, %v3997_v50 }
 0x796   :  { %v2140_v24 = vmul.f32 %v2126_v30, %v4003_v28  ;;  %v2141_v46 = vmul.f32 %v2126_v30, %v4009_v42  ;;  %v2142_v26 = vmul.f32 %v2126_v30, %v4015_v43  ;;  %v2143_v60 = vmul.f32 %v2126_v30, %v4021_v13 }
 0x797   :  { %v2364_v27 = vpop.permute.xlu1 %2363 }
 0x798   :  { %v2366_v35 = vmul.f32 %v2364_v27, %v3901_v34  ;;  %v2367_v31 = vmul.f32 %v2364_v27, %v3903_v36  ;;  %v2368_v58 = vmul.f32 %v2364_v27, %v3919_v20  ;;  %v2369_v38 = vmul.f32 %v2364_v27, %v3921_v2 }
 0x79c   :  { %v2373_v21 = vpop.permute.xlu1 %2372 }
 0x79d   :  { %v2375_v40 = vadd.f32 %v2373_v21, %v2366_v35  ;;  %v2376_v5 = vadd.f32 %v2373_v21, %v2367_v31  ;;  %v2377_v7 = vadd.f32 %v2373_v21, %v2368_v58  ;;  %v2378_v54 = vadd.f32 %v2373_v21, %v2369_v38 }
 0x7e2   :  { %v2147_v39 = vpop.permute.xlu0 %2146 }
 0x7e3   :  { %v2149_v23 = vadd.f32 %v2147_v39, %v2128_v25  ;;  %v2150_v52 = vadd.f32 %v2147_v39, %v2129_v8  ;;  %v2151_v61 = vadd.f32 %v2147_v39, %v2130_v19  ;;  %v2152_v62 = vadd.f32 %v2147_v39, %v2131_v47 }
 0x7e4   :  { %v2153_v63 = vadd.f32 %v2147_v39, %v2132_v10  ;;  %v2154_v1 = vadd.f32 %v2147_v39, %v2133_v51  ;;  %v2155_v9 = vadd.f32 %v2147_v39, %v2134_v16  ;;  %v2156_v59 = vadd.f32 %v2147_v39, %v2135_v29 }
 0x7e5   :  { %v2387_v18 = vadd.f32 %v2375_v40, %v2149_v23  ;;  %v2388_v53 = vadd.f32 %v2376_v5, %v2150_v52  ;;  %v2389_v14 = vadd.f32 %v2377_v7, %v2151_v61  ;;  %v2390_v34 = vadd.f32 %v2378_v54, %v2152_v62 }
 0x7e6   :  { %v2157_v4 = vadd.f32 %v2147_v39, %v2136_v41  ;;  %v2158_v48 = vadd.f32 %v2147_v39, %v2137_v55  ;;  %v2159_v22 = vadd.f32 %v2147_v39, %v2138_v11  ;;  %v2160_v6 = vadd.f32 %v2147_v39, %v2139_v17 }
 0x7e7   :  { %vm2408_vm0 = vcmp.ge.f32.partialorder %v2387_v18, 0.0  ;;  %vm2409_vm4 = vcmp.ge.f32.partialorder %v2388_v53, 0.0  ;;  %vm2410_vm6 = vcmp.ge.f32.partialorder %v2389_v14, 0.0  ;;  %vm2411_vm9 = vcmp.ge.f32.partialorder %v2390_v34, 0.0 }
 0x7e8   :  { %v2412_v36 = vmul.f32 0.25, %v2387_v18  ;;  %v2413_v20 = vmul.f32 0.25, %v2388_v53  ;;  %v2414_v2 = vmul.f32 0.25, %v2389_v14  ;;  %v2415_v56 = vmul.f32 0.25, %v2390_v34 }
 0x7e9   :  { %v2161_v37 = vadd.f32 %v2147_v39, %v2140_v24  ;;  %v2162_v12 = vadd.f32 %v2147_v39, %v2141_v46  ;;  %v2163_v50 = vadd.f32 %v2147_v39, %v2142_v26  ;;  %v2164_v49 = vadd.f32 %v2147_v39, %v2143_v60 }
 0x7ea   :  { %v2416_v32 = vsel %vm2408_vm0, %v2387_v18, %v2412_v36  ;;  %v2417_v3 = vsel %vm2409_vm4, %v2388_v53, %v2413_v20  ;;  %v2418_v44 = vsel %vm2410_vm6, %v2389_v14, %v2414_v2  ;;  %v2419_v0 = vsel %vm2411_vm9, %v2390_v34, %v2415_v56 }
 0x7eb   :  { %v2424_v33 = vcombine.low %v2416_v32, %v2417_v3  ;;  %v2425_v15 = vcombine.low %v2418_v44, %v2419_v0 }
 0x7ed   :  { %2428 = vst [vmem:[#allocation7] sm:$0xff] %v2424_v33  ;;  %2429 = vst [vmem:[#allocation7 + $0x8] sm:$0xff] %v2425_v15 }
 0x803   :  { %v2394_v45 = vpop.permute.xlu1 %2393 }
 0x804   :  { %v2396_v28 = vadd.f32 %v2394_v45, %v2153_v63  ;;  %v2397_v57 = vadd.f32 %v2394_v45, %v2154_v1  ;;  %v2398_v42 = vadd.f32 %v2394_v45, %v2155_v9  ;;  %v2399_v27 = vadd.f32 %v2394_v45, %v2156_v59 }
 0x805   :  { %v2400_v43 = vadd.f32 %v2394_v45, %v2157_v4  ;;  %v2401_v25 = vadd.f32 %v2394_v45, %v2158_v48  ;;  %v2402_v13 = vadd.f32 %v2394_v45, %v2159_v22  ;;  %v2403_v30 = vadd.f32 %v2394_v45, %v2160_v6 }
 0x806   :  { %v2404_v8 = vadd.f32 %v2394_v45, %v2161_v37  ;;  %v2405_v19 = vadd.f32 %v2394_v45, %v2162_v12  ;;  %v2406_v47 = vadd.f32 %v2394_v45, %v2163_v50  ;;  %v2407_v35 = vadd.f32 %v2394_v45, %v2164_v49 }
 0x807   :  { %vm2430_vm5 = vcmp.ge.f32.partialorder %v2396_v28, 0.0  ;;  %vm2431_vm7 = vcmp.ge.f32.partialorder %v2397_v57, 0.0  ;;  %vm2432_vm8 = vcmp.ge.f32.partialorder %v2398_v42, 0.0  ;;  %vm2433_vm10 = vcmp.ge.f32.partialorder %v2399_v27, 0.0 }
 0x808   :  { %vm2434_vm11 = vcmp.ge.f32.partialorder %v2400_v43, 0.0  ;;  %vm2435_vm12 = vcmp.ge.f32.partialorder %v2401_v25, 0.0  ;;  %vm2436_vm13 = vcmp.ge.f32.partialorder %v2402_v13, 0.0  ;;  %vm2437_vm14 = vcmp.ge.f32.partialorder %v2403_v30, 0.0 }
 0x809   :  { %vm2438_vm15 = vcmp.ge.f32.partialorder %v2404_v8, 0.0  ;;  %vm2439_vm1 = vcmp.ge.f32.partialorder %v2405_v19, 0.0  ;;  %vm2440_vm2 = vcmp.ge.f32.partialorder %v2406_v47, 0.0  ;;  %vm2441_vm3 = vcmp.ge.f32.partialorder %v2407_v35, 0.0 }
 0x80a   :  { %v2442_v31 = vmul.f32 0.25, %v2396_v28  ;;  %v2443_v58 = vmul.f32 0.25, %v2397_v57  ;;  %v2444_v38 = vmul.f32 0.25, %v2398_v42  ;;  %v2445_v21 = vmul.f32 0.25, %v2399_v27 }
 0x80b   :  { %v2446_v39 = vmul.f32 0.25, %v2400_v43  ;;  %v2447_v23 = vmul.f32 0.25, %v2401_v25  ;;  %v2448_v52 = vmul.f32 0.25, %v2402_v13  ;;  %v2449_v61 = vmul.f32 0.25, %v2403_v30 }
 0x80c   :  { %v2450_v62 = vmul.f32 0.25, %v2404_v8  ;;  %v2451_v40 = vmul.f32 0.25, %v2405_v19  ;;  %v2452_v5 = vmul.f32 0.25, %v2406_v47  ;;  %v2453_v7 = vmul.f32 0.25, %v2407_v35 }
 0x80d   :  { %v2454_v54 = vsel %vm2430_vm5, %v2396_v28, %v2442_v31  ;;  %v2455_v18 = vsel %vm2431_vm7, %v2397_v57, %v2443_v58  ;;  %v2456_v53 = vsel %vm2432_vm8, %v2398_v42, %v2444_v38  ;;  %v2457_v14 = vsel %vm2433_vm10, %v2399_v27, %v2445_v21 }
 0x80e   :  { %v2458_v34 = vsel %vm2434_vm11, %v2400_v43, %v2446_v39  ;;  %v2459_v36 = vsel %vm2435_vm12, %v2401_v25, %v2447_v23  ;;  %v2460_v20 = vsel %vm2436_vm13, %v2402_v13, %v2448_v52  ;;  %v2461_v2 = vsel %vm2437_vm14, %v2403_v30, %v2449_v61 }
 0x80f   :  { %v2462_v56 = vsel %vm2438_vm15, %v2404_v8, %v2450_v62  ;;  %v2463_v32 = vsel %vm2439_vm1, %v2405_v19, %v2451_v40  ;;  %v2464_v3 = vsel %vm2440_vm2, %v2406_v47, %v2452_v5  ;;  %v2465_v44 = vsel %vm2441_vm3, %v2407_v35, %v2453_v7 }
 0x810   :  { %v2478_v0 = vcombine.low %v2454_v54, %v2455_v18  ;;  %v2479_v33 = vcombine.low %v2456_v53, %v2457_v14  ;;  %v2480_v15 = vcombine.low %v2458_v34, %v2459_v36  ;;  %v2481_v10 = vcombine.low %v2460_v20, %v2461_v2 }
 0x811   :  { %v2482_v51 = vcombine.low %v2462_v56, %v2463_v32  ;;  %v2483_v16 = vcombine.low %v2464_v3, %v2465_v44 }
 0x812   :  { %2490 = vst [vmem:[#allocation7 + $0x10] sm:$0xff] %v2478_v0  ;;  %2491 = vst [vmem:[#allocation7 + $0x18] sm:$0xff] %v2479_v33 }
 0x813   :  { %2492 = vst [vmem:[#allocation7 + $0x20] sm:$0xff] %v2480_v15  ;;  %2493 = vst [vmem:[#allocation7 + $0x28] sm:$0xff] %v2481_v10 }
 0x814   :  { %2494 = vst [vmem:[#allocation7 + $0x30] sm:$0xff] %v2482_v51  ;;  %2495 = vst [vmem:[#allocation7 + $0x38] sm:$0xff] %v2483_v16 }
 0x815   :  { %2745 = shalt.err (!%p2742_p6)
}
 0x816   :  { %s2746_s23 = scalar_lea.hbm %s4122_s2, 1024 }
 0x817   :  { %p2747_p7 = scmp.ne.s32.totalorder %s4122_s2, %s2746_s23  ;;  %p2750_p8 = scmp.lt.u32.totalorder %s2746_s23, %s4122_s2 }
 0x819   :  { %p2752_p9 = pnand %p2750_p8, %p2747_p7 }
 0x81b   :  { %2755 = shalt.err (!%p2752_p9)
}
 0x81c   :  { %2505 = dma.vmem_to_hbm [thread:$0]  %s2503_s19, 1024, %s4122_s2, [#allocation4]  }
 0x81d   :  { %2760 = dma.done.wait [#allocation4], 1024  }
 0x81e   :  { %2761 = vsyncadd [#allocation4], 4294966272 }
 0x81f   :  { %2509 = vsyncpa [#allocation3], 1 }
 0x820   :  { %2510 = vsyncpa [#allocation6], 1 }
 0x821   :  { %2511 = vsyncpa [#allocation4], 1 }

</bundles_post_ra>
